<compile_context>
chip_gen: v7x
topology: tpu7x:2x2x1
jax: 0.10.0
libtpu: 0.0.40
codegen_flags: <defaults>
</compile_context>

<pallas_src>
import functools

import jax
import jax.numpy as jnp
from jax.experimental import pallas as pl
from jax.experimental.pallas import tpu as pltpu


@functools.lru_cache(maxsize=None)
def _vmem_limit_bytes():
    """<= 3/4 of physical VMEM, capped at 64 MiB (conservative fallback)."""
    cap = None
    try:
        cap = getattr(pltpu.get_tpu_info(), "vmem_capacity_bytes", None)
    except Exception:
        cap = None
    if not cap:
        return 48 * 1024 * 1024
    return int(min(cap * 3 // 4, 64 * 1024 * 1024))


# ----------------------------------------------------------------------------
# Kernel 1: tiled linear layer  y = x @ W + b  (used for the fused-QKV GEMM)
# ----------------------------------------------------------------------------
def _linear_kernel(x_ref, w_ref, b_ref, o_ref):
    # Native-dtype operands straight to the MXU; only the accumulator is f32.
    acc = jnp.dot(x_ref[...], w_ref[...], preferred_element_type=jnp.float32)
    o_ref[...] = (acc + b_ref[...].astype(jnp.float32)).astype(o_ref.dtype)


def pallas_linear(x2d, w, b2d, *, tm_target=512, resident_w_bytes=8 * 1024 * 1024):
    M, K = x2d.shape
    Nout = w.shape[1]
    itemsize = jnp.dtype(x2d.dtype).itemsize

    # Row tile: full M when small, else 512 (multiple of 8). No pad/copy —
    # pl.cdiv grid + Pallas' ragged last block handles M % tm != 0 (tail rows
    # depend only on themselves, so the dropped out-of-bounds rows are inert).
    tm = M if M <= tm_target else tm_target
    n_row_tiles = pl.cdiv(M, tm)

    vmem_limit = _vmem_limit_bytes()
    cost = pl.CostEstimate(
        flops=2 * M * K * Nout,
        transcendentals=0,
        bytes_accessed=(M * K + K * Nout + M * Nout + Nout) * itemsize,
    )
    w_bytes = K * Nout * jnp.dtype(w.dtype).itemsize

    if w_bytes <= resident_w_bytes or Nout % 256 != 0:
        # Weight + bias fully VMEM-resident: constant block index => DMA'd
        # once for the whole call, regardless of the number of row tiles.
        return pl.pallas_call(
            _linear_kernel,
            out_shape=jax.ShapeDtypeStruct((M, Nout), x2d.dtype),
            grid=(n_row_tiles,),
            in_specs=[
                pl.BlockSpec((tm, K), lambda i: (i, 0)),
                pl.BlockSpec((K, Nout), lambda i: (0, 0)),
                pl.BlockSpec((1, Nout), lambda i: (0, 0)),
            ],
            out_specs=pl.BlockSpec((tm, Nout), lambda i: (i, 0)),
            compiler_params=pltpu.CompilerParams(
                dimension_semantics=("parallel",),
                vmem_limit_bytes=vmem_limit,
            ),
            cost_estimate=cost,
        )(x2d, w, b2d)

    # Large weight: tile Nout with the Nout axis OUTER so the (K, tn) weight
    # block index is constant along the inner row axis (weight fetched
    # Nout/tn times total, not once per row tile).
    tn = 512 if Nout % 512 == 0 else 256
    return pl.pallas_call(
        _linear_kernel,
        out_shape=jax.ShapeDtypeStruct((M, Nout), x2d.dtype),
        grid=(Nout // tn, n_row_tiles),
        in_specs=[
            pl.BlockSpec((tm, K), lambda j, i: (i, 0)),
            pl.BlockSpec((K, tn), lambda j, i: (0, j)),
            pl.BlockSpec((1, tn), lambda j, i: (0, j)),
        ],
        out_specs=pl.BlockSpec((tm, tn), lambda j, i: (i, j)),
        compiler_params=pltpu.CompilerParams(
            dimension_semantics=("parallel", "parallel"),
            vmem_limit_bytes=vmem_limit,
        ),
        cost_estimate=cost,
    )(x2d, w, b2d)


# ----------------------------------------------------------------------------
# Kernel 2: fused multi-head attention + output projection, one batch per
# grid step, consuming the fused-QKV activation (B, N, 3C) directly.
# ----------------------------------------------------------------------------
def _attn_proj_kernel(qkv_ref, wp_ref, bp_ref, o_ref, acc_ref,
                      *, num_heads, head_dim):
    # qkv_ref: (1, N, 3C)   wp_ref: (C, C)   bp_ref: (1, C)
    # o_ref:   (1, N, C)    acc_ref: VMEM scratch (N, C) f32
    C = num_heads * head_dim

    # Static head loop; q/k/v slices are read lazily from the ref per head so
    # the whole (N, 3C) slab is never one live value.
    for h in range(num_heads):
        lo = h * head_dim
        q = qkv_ref[0, :, lo:lo + head_dim]                 # (N, Dh); scale pre-folded
        k = qkv_ref[0, :, C + lo:C + lo + head_dim]         # (N, Dh)
        v = qkv_ref[0, :, 2 * C + lo:2 * C + lo + head_dim]  # (N, Dh)

        # q @ k^T without materializing a transpose of k.
        s = jax.lax.dot_general(
            q, k, (((1,), (1,)), ((), ())),
            preferred_element_type=jnp.float32)              # (N, N) f32
        m = jnp.max(s, axis=-1, keepdims=True)
        p = jnp.exp(s - m)
        l = jnp.sum(p, axis=-1, keepdims=True)               # (N, 1)

        o = jax.lax.dot_general(
            p.astype(v.dtype), v, (((1,), (0,)), ((), ())),
            preferred_element_type=jnp.float32)               # (N, Dh) f32
        # Deferred normalization via EUP reciprocal (multiply, not divide).
        acc_ref[:, lo:lo + head_dim] = o * pl.reciprocal(l, approx=True)

    # Fused output projection (norm = Identity), single lane-dense store.
    out = jnp.dot(acc_ref[...].astype(wp_ref.dtype), wp_ref[...],
                  preferred_element_type=jnp.float32)
    o_ref[0] = (out + bp_ref[...].astype(jnp.float32)).astype(o_ref.dtype)


def pallas_attention_proj(qkv, w_proj, b_proj2d, *, num_heads, head_dim):
    B, N, C3 = qkv.shape
    C = num_heads * head_dim
    assert C3 == 3 * C
    itemsize = jnp.dtype(qkv.dtype).itemsize
    kern = functools.partial(
        _attn_proj_kernel, num_heads=num_heads, head_dim=head_dim)
    return pl.pallas_call(
        kern,
        out_shape=jax.ShapeDtypeStruct((B, N, C), qkv.dtype),
        grid=(B,),
        in_specs=[
            pl.BlockSpec((1, N, C3), lambda b: (b, 0, 0)),
            pl.BlockSpec((C, C), lambda b: (0, 0)),   # W_proj resident
            pl.BlockSpec((1, C), lambda b: (0, 0)),    # b_proj resident
        ],
        out_specs=pl.BlockSpec((1, N, C), lambda b: (b, 0, 0)),
        scratch_shapes=[pltpu.VMEM((N, C), jnp.float32)],
        compiler_params=pltpu.CompilerParams(
            dimension_semantics=("parallel",),
            vmem_limit_bytes=_vmem_limit_bytes(),
        ),
        cost_estimate=pl.CostEstimate(
            flops=4 * B * num_heads * N * N * head_dim + 2 * B * N * C * C,
            transcendentals=B * num_heads * N * N,
            bytes_accessed=(B * N * C3 + C * C + C + B * N * C) * itemsize,
        ),
    )(qkv, w_proj, b_proj2d)


# ----------------------------------------------------------------------------
# Parameter prep (one-time transforms hoisted out of the forward) + forward
# ----------------------------------------------------------------------------
def prepare_params(w_qkv, q_bias, v_bias, w_proj, b_proj, *, num_heads,
                   compute_dtype=None):
    """w_qkv: (C, 3C), w_proj: (C, C)  (both transposed vs PyTorch layout)."""
    C = q_bias.shape[0]
    scale = (C // num_heads) ** -0.5
    # Fold 1/sqrt(head_dim) into the q columns of the fused weight and q_bias.
    w_qkv = jnp.concatenate([w_qkv[:, :C] * scale, w_qkv[:, C:]], axis=1)
    # Fused qkv bias = cat(q_bias*scale, k_bias=0, v_bias), pre-shaped (1, 3C).
    qkv_bias = jnp.concatenate(
        [q_bias * scale, jnp.zeros_like(q_bias), v_bias]).reshape(1, 3 * C)
    params = {
        "w_qkv": w_qkv,                      # (C, 3C)
        "qkv_bias": qkv_bias,                # (1, 3C)
        "w_proj": w_proj,                    # (C, C)
        "b_proj": b_proj.reshape(1, C),      # (1, C)
    }
    if compute_dtype is not None:            # e.g. jnp.bfloat16 for native MXU rate
        params = jax.tree_util.tree_map(
            lambda a: a.astype(compute_dtype), params)
    return params


def eva_attention_forward(x, params, *, num_heads):
    B, N, C = x.shape
    head_dim = C // num_heads
    if x.dtype != params["w_qkv"].dtype:
        x = x.astype(params["w_qkv"].dtype)

    x2d = x.reshape(B * N, C)                                        # free
    qkv2d = pallas_linear(x2d, params["w_qkv"], params["qkv_bias"])  # (B*N, 3C)
    qkv = qkv2d.reshape(B, N, 3 * C)                                 # free

    # Attention + norm(Identity) + output projection fused in one kernel.
    return pallas_attention_proj(qkv, params["w_proj"], params["b_proj"],
                                 num_heads=num_heads, head_dim=head_dim)


# ----------------------------------------------------------------------------
# Pure-JAX reference on the RAW (unfolded) weights, mirroring PyTorch forward
# ----------------------------------------------------------------------------
def ref_forward(x, w_qkv, q_bias, v_bias, w_proj, b_proj, *, num_heads):
    B, N, C = x.shape
    Dh = C // num_heads
    scale = Dh ** -0.5
    qkv_bias = jnp.concatenate([q_bias, jnp.zeros_like(q_bias), v_bias])
    qkv = x.reshape(B * N, C) @ w_qkv + qkv_bias
    qkv = qkv.reshape(B, N, 3, num_heads, Dh).transpose(2, 0, 3, 1, 4)
    q, k, v = qkv[0], qkv[1], qkv[2]
    s = jnp.einsum("bhqd,bhkd->bhqk", q * scale, k)
    p = jax.nn.softmax(s, axis=-1)
    o = jnp.einsum("bhqk,bhkd->bhqd", p, v)
    o = o.transpose(0, 2, 1, 3).reshape(B * N, C)
    out = o @ w_proj + b_proj
    return out.reshape(B, N, C)


if __name__ == "__main__":
    # Small but TPU-natural shapes: head_dim = 64 keeps lane slices aligned.
    B, N, C, H = 2, 16, 256, 4

    key = jax.random.PRNGKey(0)
    kx, kw1, kbq, kbv, kw2, kb2 = jax.random.split(key, 6)

    x = jax.random.normal(kx, (B, N, C), dtype=jnp.float32)

    # qkv.weight in PyTorch is (3C, C); stored transposed as (C, 3C).
    w_qkv = jax.random.normal(kw1, (C, 3 * C), dtype=jnp.float32) * 0.02
    q_bias = jax.random.normal(kbq, (C,), dtype=jnp.float32) * 0.02
    v_bias = jax.random.normal(kbv, (C,), dtype=jnp.float32) * 0.02
    # proj.weight in PyTorch is (C, C); stored transposed as (C, C).
    w_proj = jax.random.normal(kw2, (C, C), dtype=jnp.float32) * 0.02
    b_proj = jax.random.normal(kb2, (C,), dtype=jnp.float32) * 0.02

    params = prepare_params(w_qkv, q_bias, v_bias, w_proj, b_proj, num_heads=H)

    fwd = jax.jit(functools.partial(eva_attention_forward, num_heads=H))
    out = jax.block_until_ready(fwd(x, params))

    ref = ref_forward(x, w_qkv, q_bias, v_bias, w_proj, b_proj, num_heads=H)
    assert out.shape == (B, N, C)
    # Tolerance covers the approx-reciprocal softmax normalization.
    assert jnp.allclose(out, ref, atol=2e-3, rtol=2e-2), float(
        jnp.max(jnp.abs(out - ref)))

    print("KERNEL_OK")
</pallas_src>

<mosaic_0001>
module attributes {stable_mosaic.version = 11 : i64} {
  func.func @_attn_proj_kernel(%arg0: i32, %arg1: memref<1x16x768xf32, #tpu.memory_space<vmem>>, %arg2: memref<256x256xf32, #tpu.memory_space<vmem>>, %arg3: memref<1x256xf32, #tpu.memory_space<vmem>>, %arg4: memref<1x16x256xf32, #tpu.memory_space<vmem>>, %arg5: memref<16x256xf32, #tpu.memory_space<vmem>>) attributes {dimension_semantics = [#tpu.dimension_semantics<parallel>], iteration_bounds = array<i64: 2>, scalar_prefetch = 0 : i64, scratch_operands = 1 : i64, tpu.core_type = #tpu.core_type<tc>, window_params = [{transform_indices = @transform_0, window_bounds = array<i64: 1, 16, 768>}, {pipeline_mode = #tpu.pipeline_mode<synchronous>, transform_indices = @transform_1, window_bounds = array<i64: 256, 256>}, {pipeline_mode = #tpu.pipeline_mode<synchronous>, transform_indices = @transform_2, window_bounds = array<i64: 1, 256>}, {transform_indices = @transform_3, window_bounds = array<i64: 1, 16, 256>}]} {
    %c0 = arith.constant 0 : index
    %c0_0 = arith.constant 0 : index
    %c0_1 = arith.constant 0 : index
    %0 = vector.load %arg1[%c0, %c0_0, %c0_1] : memref<1x16x768xf32, #tpu.memory_space<vmem>>, vector<1x16x64xf32>
    %1 = vector.shape_cast %0 : vector<1x16x64xf32> to vector<16x64xf32>
    %c0_2 = arith.constant 0 : index
    %c0_3 = arith.constant 0 : index
    %c256 = arith.constant 256 : index
    %2 = vector.load %arg1[%c0_2, %c0_3, %c256] : memref<1x16x768xf32, #tpu.memory_space<vmem>>, vector<1x16x64xf32>
    %3 = vector.shape_cast %2 : vector<1x16x64xf32> to vector<16x64xf32>
    %c0_4 = arith.constant 0 : index
    %c0_5 = arith.constant 0 : index
    %c512 = arith.constant 512 : index
    %4 = vector.load %arg1[%c0_4, %c0_5, %c512] : memref<1x16x768xf32, #tpu.memory_space<vmem>>, vector<1x16x64xf32>
    %5 = vector.shape_cast %4 : vector<1x16x64xf32> to vector<16x64xf32>
    %cst = arith.constant dense<0.000000e+00> : vector<16x16xf32>
    %6 = tpu.matmul %1, %3, %cst {dimension_numbers = #tpu.dot_dimension_numbers<[1], [1], [0], [0], [0, 0, 1, 0], [], []>} : vector<16x64xf32>, vector<16x64xf32>, vector<16x16xf32> -> vector<16x16xf32>
    %cst_6 = arith.constant dense<0xFF800000> : vector<16xf32>
    %7 = vector.multi_reduction <maximumf>, %6, %cst_6 [1] : vector<16x16xf32> to vector<16xf32>
    %8 = vector.shape_cast %7 : vector<16xf32> to vector<16x1xf32>
    %9 = vector.broadcast %8 : vector<16x1xf32> to vector<16x16xf32>
    %10 = arith.subf %6, %9 : vector<16x16xf32>
    %11 = math.exp %10 : vector<16x16xf32>
    %cst_7 = arith.constant dense<0.000000e+00> : vector<16xf32>
    %12 = vector.multi_reduction <add>, %11, %cst_7 [1] : vector<16x16xf32> to vector<16xf32>
    %13 = vector.shape_cast %12 : vector<16xf32> to vector<16x1xf32>
    %cst_8 = arith.constant dense<0.000000e+00> : vector<16x64xf32>
    %14 = tpu.matmul %11, %5, %cst_8 {dimension_numbers = #tpu.dot_dimension_numbers<[1], [0], [0], [1], [0, 0, 1, 1], [], []>} : vector<16x16xf32>, vector<16x64xf32>, vector<16x64xf32> -> vector<16x64xf32>
    %15 = tpu.reciprocal %13 {approx = true} : vector<16x1xf32> -> vector<16x1xf32>
    %16 = vector.broadcast %15 : vector<16x1xf32> to vector<16x64xf32>
    %17 = arith.mulf %14, %16 : vector<16x64xf32>
    %c0_9 = arith.constant 0 : index
    %c0_10 = arith.constant 0 : index
    %18 = vector.load %arg5[%c0_9, %c0_10] : memref<16x256xf32, #tpu.memory_space<vmem>>, vector<16x64xf32>
    tpu.vector_store %arg5[%c0_9, %c0_10], %17 {strides = array<i32>} : memref<16x256xf32, #tpu.memory_space<vmem>>, vector<16x64xf32>,
    %c0_11 = arith.constant 0 : index
    %c0_12 = arith.constant 0 : index
    %c64 = arith.constant 64 : index
    %19 = vector.load %arg1[%c0_11, %c0_12, %c64] : memref<1x16x768xf32, #tpu.memory_space<vmem>>, vector<1x16x64xf32>
    %20 = vector.shape_cast %19 : vector<1x16x64xf32> to vector<16x64xf32>
    %c0_13 = arith.constant 0 : index
    %c0_14 = arith.constant 0 : index
    %c320 = arith.constant 320 : index
    %21 = vector.load %arg1[%c0_13, %c0_14, %c320] : memref<1x16x768xf32, #tpu.memory_space<vmem>>, vector<1x16x64xf32>
    %22 = vector.shape_cast %21 : vector<1x16x64xf32> to vector<16x64xf32>
    %c0_15 = arith.constant 0 : index
    %c0_16 = arith.constant 0 : index
    %c576 = arith.constant 576 : index
    %23 = vector.load %arg1[%c0_15, %c0_16, %c576] : memref<1x16x768xf32, #tpu.memory_space<vmem>>, vector<1x16x64xf32>
    %24 = vector.shape_cast %23 : vector<1x16x64xf32> to vector<16x64xf32>
    %cst_17 = arith.constant dense<0.000000e+00> : vector<16x16xf32>
    %25 = tpu.matmul %20, %22, %cst_17 {dimension_numbers = #tpu.dot_dimension_numbers<[1], [1], [0], [0], [0, 0, 1, 0], [], []>} : vector<16x64xf32>, vector<16x64xf32>, vector<16x16xf32> -> vector<16x16xf32>
    %cst_18 = arith.constant dense<0xFF800000> : vector<16xf32>
    %26 = vector.multi_reduction <maximumf>, %25, %cst_18 [1] : vector<16x16xf32> to vector<16xf32>
    %27 = vector.shape_cast %26 : vector<16xf32> to vector<16x1xf32>
    %28 = vector.broadcast %27 : vector<16x1xf32> to vector<16x16xf32>
    %29 = arith.subf %25, %28 : vector<16x16xf32>
    %30 = math.exp %29 : vector<16x16xf32>
    %cst_19 = arith.constant dense<0.000000e+00> : vector<16xf32>
    %31 = vector.multi_reduction <add>, %30, %cst_19 [1] : vector<16x16xf32> to vector<16xf32>
    %32 = vector.shape_cast %31 : vector<16xf32> to vector<16x1xf32>
    %cst_20 = arith.constant dense<0.000000e+00> : vector<16x64xf32>
    %33 = tpu.matmul %30, %24, %cst_20 {dimension_numbers = #tpu.dot_dimension_numbers<[1], [0], [0], [1], [0, 0, 1, 1], [], []>} : vector<16x16xf32>, vector<16x64xf32>, vector<16x64xf32> -> vector<16x64xf32>
    %34 = tpu.reciprocal %32 {approx = true} : vector<16x1xf32> -> vector<16x1xf32>
    %35 = vector.broadcast %34 : vector<16x1xf32> to vector<16x64xf32>
    %36 = arith.mulf %33, %35 : vector<16x64xf32>
    %c0_21 = arith.constant 0 : index
    %c64_22 = arith.constant 64 : index
    %37 = vector.load %arg5[%c0_21, %c64_22] : memref<16x256xf32, #tpu.memory_space<vmem>>, vector<16x64xf32>
    tpu.vector_store %arg5[%c0_21, %c64_22], %36 {strides = array<i32>} : memref<16x256xf32, #tpu.memory_space<vmem>>, vector<16x64xf32>,
    %c0_23 = arith.constant 0 : index
    %c0_24 = arith.constant 0 : index
    %c128 = arith.constant 128 : index
    %38 = vector.load %arg1[%c0_23, %c0_24, %c128] : memref<1x16x768xf32, #tpu.memory_space<vmem>>, vector<1x16x64xf32>
    %39 = vector.shape_cast %38 : vector<1x16x64xf32> to vector<16x64xf32>
    %c0_25 = arith.constant 0 : index
    %c0_26 = arith.constant 0 : index
    %c384 = arith.constant 384 : index
    %40 = vector.load %arg1[%c0_25, %c0_26, %c384] : memref<1x16x768xf32, #tpu.memory_space<vmem>>, vector<1x16x64xf32>
    %41 = vector.shape_cast %40 : vector<1x16x64xf32> to vector<16x64xf32>
    %c0_27 = arith.constant 0 : index
    %c0_28 = arith.constant 0 : index
    %c640 = arith.constant 640 : index
    %42 = vector.load %arg1[%c0_27, %c0_28, %c640] : memref<1x16x768xf32, #tpu.memory_space<vmem>>, vector<1x16x64xf32>
    %43 = vector.shape_cast %42 : vector<1x16x64xf32> to vector<16x64xf32>
    %cst_29 = arith.constant dense<0.000000e+00> : vector<16x16xf32>
    %44 = tpu.matmul %39, %41, %cst_29 {dimension_numbers = #tpu.dot_dimension_numbers<[1], [1], [0], [0], [0, 0, 1, 0], [], []>} : vector<16x64xf32>, vector<16x64xf32>, vector<16x16xf32> -> vector<16x16xf32>
    %cst_30 = arith.constant dense<0xFF800000> : vector<16xf32>
    %45 = vector.multi_reduction <maximumf>, %44, %cst_30 [1] : vector<16x16xf32> to vector<16xf32>
    %46 = vector.shape_cast %45 : vector<16xf32> to vector<16x1xf32>
    %47 = vector.broadcast %46 : vector<16x1xf32> to vector<16x16xf32>
    %48 = arith.subf %44, %47 : vector<16x16xf32>
    %49 = math.exp %48 : vector<16x16xf32>
    %cst_31 = arith.constant dense<0.000000e+00> : vector<16xf32>
    %50 = vector.multi_reduction <add>, %49, %cst_31 [1] : vector<16x16xf32> to vector<16xf32>
    %51 = vector.shape_cast %50 : vector<16xf32> to vector<16x1xf32>
    %cst_32 = arith.constant dense<0.000000e+00> : vector<16x64xf32>
    %52 = tpu.matmul %49, %43, %cst_32 {dimension_numbers = #tpu.dot_dimension_numbers<[1], [0], [0], [1], [0, 0, 1, 1], [], []>} : vector<16x16xf32>, vector<16x64xf32>, vector<16x64xf32> -> vector<16x64xf32>
    %53 = tpu.reciprocal %51 {approx = true} : vector<16x1xf32> -> vector<16x1xf32>
    %54 = vector.broadcast %53 : vector<16x1xf32> to vector<16x64xf32>
    %55 = arith.mulf %52, %54 : vector<16x64xf32>
    %c0_33 = arith.constant 0 : index
    %c128_34 = arith.constant 128 : index
    %56 = vector.load %arg5[%c0_33, %c128_34] : memref<16x256xf32, #tpu.memory_space<vmem>>, vector<16x64xf32>
    tpu.vector_store %arg5[%c0_33, %c128_34], %55 {strides = array<i32>} : memref<16x256xf32, #tpu.memory_space<vmem>>, vector<16x64xf32>,
    %c0_35 = arith.constant 0 : index
    %c0_36 = arith.constant 0 : index
    %c192 = arith.constant 192 : index
    %57 = vector.load %arg1[%c0_35, %c0_36, %c192] : memref<1x16x768xf32, #tpu.memory_space<vmem>>, vector<1x16x64xf32>
    %58 = vector.shape_cast %57 : vector<1x16x64xf32> to vector<16x64xf32>
    %c0_37 = arith.constant 0 : index
    %c0_38 = arith.constant 0 : index
    %c448 = arith.constant 448 : index
    %59 = vector.load %arg1[%c0_37, %c0_38, %c448] : memref<1x16x768xf32, #tpu.memory_space<vmem>>, vector<1x16x64xf32>
    %60 = vector.shape_cast %59 : vector<1x16x64xf32> to vector<16x64xf32>
    %c0_39 = arith.constant 0 : index
    %c0_40 = arith.constant 0 : index
    %c704 = arith.constant 704 : index
    %61 = vector.load %arg1[%c0_39, %c0_40, %c704] : memref<1x16x768xf32, #tpu.memory_space<vmem>>, vector<1x16x64xf32>
    %62 = vector.shape_cast %61 : vector<1x16x64xf32> to vector<16x64xf32>
    %cst_41 = arith.constant dense<0.000000e+00> : vector<16x16xf32>
    %63 = tpu.matmul %58, %60, %cst_41 {dimension_numbers = #tpu.dot_dimension_numbers<[1], [1], [0], [0], [0, 0, 1, 0], [], []>} : vector<16x64xf32>, vector<16x64xf32>, vector<16x16xf32> -> vector<16x16xf32>
    %cst_42 = arith.constant dense<0xFF800000> : vector<16xf32>
    %64 = vector.multi_reduction <maximumf>, %63, %cst_42 [1] : vector<16x16xf32> to vector<16xf32>
    %65 = vector.shape_cast %64 : vector<16xf32> to vector<16x1xf32>
    %66 = vector.broadcast %65 : vector<16x1xf32> to vector<16x16xf32>
    %67 = arith.subf %63, %66 : vector<16x16xf32>
    %68 = math.exp %67 : vector<16x16xf32>
    %cst_43 = arith.constant dense<0.000000e+00> : vector<16xf32>
    %69 = vector.multi_reduction <add>, %68, %cst_43 [1] : vector<16x16xf32> to vector<16xf32>
    %70 = vector.shape_cast %69 : vector<16xf32> to vector<16x1xf32>
    %cst_44 = arith.constant dense<0.000000e+00> : vector<16x64xf32>
    %71 = tpu.matmul %68, %62, %cst_44 {dimension_numbers = #tpu.dot_dimension_numbers<[1], [0], [0], [1], [0, 0, 1, 1], [], []>} : vector<16x16xf32>, vector<16x64xf32>, vector<16x64xf32> -> vector<16x64xf32>
    %72 = tpu.reciprocal %70 {approx = true} : vector<16x1xf32> -> vector<16x1xf32>
    %73 = vector.broadcast %72 : vector<16x1xf32> to vector<16x64xf32>
    %74 = arith.mulf %71, %73 : vector<16x64xf32>
    %c0_45 = arith.constant 0 : index
    %c192_46 = arith.constant 192 : index
    %75 = vector.load %arg5[%c0_45, %c192_46] : memref<16x256xf32, #tpu.memory_space<vmem>>, vector<16x64xf32>
    tpu.vector_store %arg5[%c0_45, %c192_46], %74 {strides = array<i32>} : memref<16x256xf32, #tpu.memory_space<vmem>>, vector<16x64xf32>,
    %c0_47 = arith.constant 0 : index
    %c0_48 = arith.constant 0 : index
    %76 = vector.load %arg5[%c0_47, %c0_48] : memref<16x256xf32, #tpu.memory_space<vmem>>, vector<16x256xf32>
    %c0_49 = arith.constant 0 : index
    %c0_50 = arith.constant 0 : index
    %77 = vector.load %arg2[%c0_49, %c0_50] : memref<256x256xf32, #tpu.memory_space<vmem>>, vector<256x256xf32>
    %cst_51 = arith.constant dense<0.000000e+00> : vector<16x256xf32>
    %78 = tpu.matmul %76, %77, %cst_51 {dimension_numbers = #tpu.dot_dimension_numbers<[1], [0], [0], [1], [0, 0, 1, 1], [], []>} : vector<16x256xf32>, vector<256x256xf32>, vector<16x256xf32> -> vector<16x256xf32>
    %c0_52 = arith.constant 0 : index
    %c0_53 = arith.constant 0 : index
    %79 = vector.load %arg3[%c0_52, %c0_53] : memref<1x256xf32, #tpu.memory_space<vmem>>, vector<1x256xf32>
    %80 = vector.broadcast %79 : vector<1x256xf32> to vector<16x256xf32>
    %81 = arith.addf %78, %80 : vector<16x256xf32>
    %c0_54 = arith.constant 0 : index
    %c0_55 = arith.constant 0 : index
    %c0_56 = arith.constant 0 : index
    %82 = vector.load %arg4[%c0_54, %c0_55, %c0_56] : memref<1x16x256xf32, #tpu.memory_space<vmem>>, vector<1x16x256xf32>
    %83 = vector.shape_cast %82 : vector<1x16x256xf32> to vector<16x256xf32>
    %84 = vector.shape_cast %81 : vector<16x256xf32> to vector<1x16x256xf32>
    tpu.vector_store %arg4[%c0_54, %c0_55, %c0_56], %84 {strides = array<i32>} : memref<1x16x256xf32, #tpu.memory_space<vmem>>, vector<1x16x256xf32>,
    return
  }
  func.func @transform_0(%arg0: i32) -> (i32, i32, i32) {
    %c0_i32 = arith.constant 0 : i32
    %c0_i32_0 = arith.constant 0 : i32
    %c0_i32_1 = arith.constant 0 : i32
    return %arg0, %c0_i32, %c0_i32_0 : i32, i32, i32
  }
  func.func @transform_1(%arg0: i32) -> (i32, i32) {
    %c0_i32 = arith.constant 0 : i32
    %c0_i32_0 = arith.constant 0 : i32
    %c0_i32_1 = arith.constant 0 : i32
    return %c0_i32, %c0_i32_0 : i32, i32
  }
  func.func @transform_2(%arg0: i32) -> (i32, i32) {
    %c0_i32 = arith.constant 0 : i32
    %c0_i32_0 = arith.constant 0 : i32
    %c0_i32_1 = arith.constant 0 : i32
    return %c0_i32, %c0_i32_0 : i32, i32
  }
  func.func @transform_3(%arg0: i32) -> (i32, i32, i32) {
    %c0_i32 = arith.constant 0 : i32
    %c0_i32_0 = arith.constant 0 : i32
    %c0_i32_1 = arith.constant 0 : i32
    return %arg0, %c0_i32, %c0_i32_0 : i32, i32, i32
  }
}

module attributes {stable_mosaic.version = 11 : i64} {
  func.func @_linear_kernel(%arg0: i32, %arg1: memref<32x256xf32, #tpu.memory_space<vmem>>, %arg2: memref<256x768xf32, #tpu.memory_space<vmem>>, %arg3: memref<1x768xf32, #tpu.memory_space<vmem>>, %arg4: memref<32x768xf32, #tpu.memory_space<vmem>>) attributes {dimension_semantics = [#tpu.dimension_semantics<parallel>], iteration_bounds = array<i64: 1>, scalar_prefetch = 0 : i64, scratch_operands = 0 : i64, tpu.core_type = #tpu.core_type<tc>, window_params = [{transform_indices = @transform_0, window_bounds = array<i64: 32, 256>}, {pipeline_mode = #tpu.pipeline_mode<synchronous>, transform_indices = @transform_1, window_bounds = array<i64: 256, 768>}, {pipeline_mode = #tpu.pipeline_mode<synchronous>, transform_indices = @transform_2, window_bounds = array<i64: 1, 768>}, {transform_indices = @transform_3, window_bounds = array<i64: 32, 768>}]} {
    %c0 = arith.constant 0 : index
    %c0_0 = arith.constant 0 : index
    %0 = vector.load %arg1[%c0, %c0_0] : memref<32x256xf32, #tpu.memory_space<vmem>>, vector<32x256xf32>
    %c0_1 = arith.constant 0 : index
    %c0_2 = arith.constant 0 : index
    %1 = vector.load %arg2[%c0_1, %c0_2] : memref<256x768xf32, #tpu.memory_space<vmem>>, vector<256x768xf32>
    %cst = arith.constant dense<0.000000e+00> : vector<32x768xf32>
    %2 = tpu.matmul %0, %1, %cst {dimension_numbers = #tpu.dot_dimension_numbers<[1], [0], [0], [1], [0, 0, 1, 1], [], []>} : vector<32x256xf32>, vector<256x768xf32>, vector<32x768xf32> -> vector<32x768xf32>
    %c0_3 = arith.constant 0 : index
    %c0_4 = arith.constant 0 : index
    %3 = vector.load %arg3[%c0_3, %c0_4] : memref<1x768xf32, #tpu.memory_space<vmem>>, vector<1x768xf32>
    %4 = vector.broadcast %3 : vector<1x768xf32> to vector<32x768xf32>
    %5 = arith.addf %2, %4 : vector<32x768xf32>
    %c0_5 = arith.constant 0 : index
    %c0_6 = arith.constant 0 : index
    %6 = vector.load %arg4[%c0_5, %c0_6] : memref<32x768xf32, #tpu.memory_space<vmem>>, vector<32x768xf32>
    tpu.vector_store %arg4[%c0_5, %c0_6], %5 {strides = array<i32>} : memref<32x768xf32, #tpu.memory_space<vmem>>, vector<32x768xf32>,
    return
  }
  func.func @transform_0(%arg0: i32) -> (i32, i32) {
    %c0_i32 = arith.constant 0 : i32
    %c0_i32_0 = arith.constant 0 : i32
    return %arg0, %c0_i32 : i32, i32
  }
  func.func @transform_1(%arg0: i32) -> (i32, i32) {
    %c0_i32 = arith.constant 0 : i32
    %c0_i32_0 = arith.constant 0 : i32
    %c0_i32_1 = arith.constant 0 : i32
    return %c0_i32, %c0_i32_0 : i32, i32
  }
  func.func @transform_2(%arg0: i32) -> (i32, i32) {
    %c0_i32 = arith.constant 0 : i32
    %c0_i32_0 = arith.constant 0 : i32
    %c0_i32_1 = arith.constant 0 : i32
    return %c0_i32, %c0_i32_0 : i32, i32
  }
  func.func @transform_3(%arg0: i32) -> (i32, i32) {
    %c0_i32 = arith.constant 0 : i32
    %c0_i32_0 = arith.constant 0 : i32
    return %arg0, %c0_i32 : i32, i32
  }
}

</mosaic_0001>

<bundles_post_ra>
// kernel: eva_attention_forward.2
= control target key start
LH: loop header
LB: loop body
LE: loop exit
PB: predicated region body
PF: predicated region fallthrough
CT: control target
= control target key end

     0   :  { %8 = vsyncpa [#allocation3], 0  ;;  %s1009_s0 = inlined_call_operand.hbm [shape: f32[32,256], index: 0, kind: input, shape index: {}]   ;;  %s1010_s1 = inlined_call_operand.hbm [shape: f32[256,768], index: 1, kind: input, shape index: {}]   ;;  %s1011_s2 = inlined_call_operand.vmem [shape: f32[1,768], index: 2, kind: input, shape index: {}]   ;;  %s1012_s3 = inlined_call_operand.vmem [shape: f32[32,768], index: 3, kind: output, shape index: {}]  }
   0x1   :  { %9 = vsyncpa [#allocation5], 0  ;;  %s849_s12 = smov [#allocation2]   ;;  %s801_s16 = scalar_lea.hbm %s1009_s0, 1024 }
   0x2   :  { %s15_s13 = sshll.u32 %s849_s12, 4  ;;  %p802_p0 = scmp.ne.s32.totalorder %s1009_s0, %s801_s16  ;;  %s16_s13 = int_to_ptr.vmem [resolvable:$true] %s15_s13 }
   0x3   :  { %p805_p1 = scmp.lt.u32.totalorder %s801_s16, %s1009_s0 }
   0x5   :  { %p807_p2 = pnand %p805_p1, %p802_p0 }
   0x7   :  { %810 = shalt.err (!%p807_p2)
}
   0x8   :  { %s811_s21 = scalar_lea.vmem %s16_s13, 1024  ;;  %p816_p4 = scmp.lt.s32.totalorder %s16_s13, %s16_s13 }
   0x9   :  { %p812_p3 = scmp.ne.s32.totalorder %s16_s13, %s811_s21  ;;  %p817_p5 = scmp.lt.s32.totalorder %s811_s21, %s811_s21 }
   0xb   :  { %p818_p6 = por %p817_p5, %p816_p4 }
   0xd   :  { %p819_p7 = pnand %p818_p6, %p812_p3 }
   0xf   :  { %822 = shalt.err (!%p819_p7)
}
  0x10   :  { %s850_s22 = smov 256   ;;  %s851_s23 = smov 16  }
  0x11   :  { %21 = dma.hbm_to_vmem [thread:$0]  %s1009_s0, 1024, %s16_s13, [#allocation3], %s850_s22, %s850_s22, %s851_s23  }
  0x12   :  { %s852_s26 = smov [#allocation4]   ;;  %s823_s30 = scalar_lea.hbm %s1010_s1, 24576 }
  0x13   :  { %s27_s27 = sshll.u32 %s852_s26, 4  ;;  %p824_p8 = scmp.ne.s32.totalorder %s1010_s1, %s823_s30  ;;  %s28_s27 = int_to_ptr.vmem [resolvable:$true] %s27_s27 }
  0x14   :  { %p827_p9 = scmp.lt.u32.totalorder %s823_s30, %s1010_s1 }
  0x16   :  { %p829_p10 = pnand %p827_p9, %p824_p8 }
  0x18   :  { %832 = shalt.err (!%p829_p10)
}
  0x19   :  { %s833_s8 = scalar_lea.vmem %s28_s27, 24576  ;;  %p838_p12 = scmp.lt.s32.totalorder %s28_s27, %s28_s27 }
  0x1a   :  { %p834_p11 = scmp.ne.s32.totalorder %s28_s27, %s833_s8  ;;  %p839_p13 = scmp.lt.s32.totalorder %s833_s8, %s833_s8 }
  0x1c   :  { %p840_p0 = por %p839_p13, %p838_p12 }
  0x1e   :  { %p841_p1 = pnand %p840_p0, %p834_p11 }
  0x20   :  { %844 = shalt.err (!%p841_p1)
}
  0x21   :  { %s853_s0 = smov 768   ;;  %s854_s9 = smov 48  }
  0x22   :  { %33 = dma.hbm_to_vmem [thread:$0]  %s1010_s1, 24576, %s28_s27, [#allocation5], %s853_s0, %s853_s0, %s854_s9  }
  0x23   :  { %845 = dma.done.wait [#allocation3], 1024  }
  0x24   :  { %846 = vsyncadd [#allocation3], 4294966272 }
  0x25   :  { %847 = dma.done.wait [#allocation5], 24576  }
  0x26   :  { %848 = vsyncadd [#allocation5], 4294942720  ;;  %v51_v0 = vld [vmem:[#allocation4 + $0x8] sm:$0xff]  ;;  %v57_v1 = vld [vmem:[#allocation4 + $0x38] sm:$0xff] }
  0x27   :  { %v53_v2 = vld [vmem:[#allocation4 + $0x18] sm:$0xff]  ;;  %v571_v3 = vpack.c.bf16 %v57_v1, %v51_v0  ;;  %v59_v4 = vld [vmem:[#allocation4 + $0x48] sm:$0xff]  ;;  %v50_v5 = vld [vmem:[#allocation4] sm:$0xff] }
  0x28   :  { %v56_v6 = vld [vmem:[#allocation4 + $0x30] sm:$0xff]  ;;  %v635_v7 = vpack.c.bf16 %v59_v4, %v53_v2  ;;  %v58_v10 = vld [vmem:[#allocation4 + $0x40] sm:$0xff]  ;;  %v63_v11 = vld [vmem:[#allocation4 + $0x68] sm:$0xff] }
  0x29   :  { %v573_v8 = vpack.c.bf16 %v56_v6, %v50_v5  ;;  %v52_v9 = vld [vmem:[#allocation4 + $0x10] sm:$0xff]  ;;  %572 = vmatprep.subr.bf16.mxu0 %v571_v3  ;;  %v69_v13 = vld [vmem:[#allocation4 + $0x98] sm:$0xff]  ;;  %v71_v15 = vld [vmem:[#allocation4 + $0xa8] sm:$0xff] }
  0x2a   :  { %v637_v12 = vpack.c.bf16 %v58_v10, %v52_v9  ;;  %v65_v14 = vld [vmem:[#allocation4 + $0x78] sm:$0xff]  ;;  %636 = vmatprep.subr.bf16.mxu1 %v635_v7  ;;  %v575_v16 = vpack.c.bf16 %v69_v13, %v63_v11  ;;  %v62_v18 = vld [vmem:[#allocation4 + $0x60] sm:$0xff]  ;;  %v68_v19 = vld [vmem:[#allocation4 + $0x90] sm:$0xff] }
  0x2b   :  { %574 = vmatpush1.bf16.msra.mxu0 %v573_v8  ;;  %v639_v17 = vpack.c.bf16 %v71_v15, %v65_v14  ;;  %v64_v20 = vld [vmem:[#allocation4 + $0x70] sm:$0xff]  ;;  %v577_v21 = vpack.c.bf16 %v68_v19, %v62_v18  ;;  %v70_v22 = vld [vmem:[#allocation4 + $0xa0] sm:$0xff]  ;;  %v75_v23 = vld [vmem:[#allocation4 + $0xc8] sm:$0xff] }
  0x2c   :  { %638 = vmatpush1.bf16.msra.mxu1 %v637_v12  ;;  %v81_v24 = vld [vmem:[#allocation4 + $0xf8] sm:$0xff]  ;;  %576 = vmatprep.subr.bf16.mxu0 %v575_v16  ;;  %v641_v25 = vpack.c.bf16 %v70_v22, %v64_v20  ;;  %v83_v28 = vld [vmem:[#allocation4 + $0x108] sm:$0xff]  ;;  %v74_v29 = vld [vmem:[#allocation4 + $0xc0] sm:$0xff] }
  0x2d   :  { %640 = vmatprep.subr.bf16.mxu1 %v639_v17  ;;  %v579_v26 = vpack.c.bf16 %v81_v24, %v75_v23  ;;  %v77_v27 = vld [vmem:[#allocation4 + $0xd8] sm:$0xff]  ;;  %v80_v31 = vld [vmem:[#allocation4 + $0xf0] sm:$0xff]  ;;  %v82_v33 = vld [vmem:[#allocation4 + $0x100] sm:$0xff] }
  0x2e   :  { %v643_v30 = vpack.c.bf16 %v83_v28, %v77_v27  ;;  %v76_v32 = vld [vmem:[#allocation4 + $0xd0] sm:$0xff]  ;;  %v581_v34 = vpack.c.bf16 %v80_v31, %v74_v29  ;;  %v87_v35 = vld [vmem:[#allocation4 + $0x128] sm:$0xff]  ;;  %v93_v36 = vld [vmem:[#allocation4 + $0x158] sm:$0xff] }
  0x2f   :  { %578 = vmatpush1.bf16.msra.mxu0 %v577_v21  ;;  %v89_v37 = vld [vmem:[#allocation4 + $0x138] sm:$0xff]  ;;  %v645_v38 = vpack.c.bf16 %v82_v33, %v76_v32  ;;  %v583_v39 = vpack.c.bf16 %v93_v36, %v87_v35  ;;  %v95_v40 = vld [vmem:[#allocation4 + $0x168] sm:$0xff]  ;;  %v86_v41 = vld [vmem:[#allocation4 + $0x120] sm:$0xff] }
  0x30   :  { %642 = vmatpush1.bf16.msra.mxu1 %v641_v25  ;;  %580 = vmatprep.subr.bf16.mxu0 %v579_v26  ;;  %v92_v42 = vld [vmem:[#allocation4 + $0x150] sm:$0xff]  ;;  %v647_v43 = vpack.c.bf16 %v95_v40, %v89_v37  ;;  %v94_v45 = vld [vmem:[#allocation4 + $0x160] sm:$0xff]  ;;  %v99_v46 = vld [vmem:[#allocation4 + $0x188] sm:$0xff] }
  0x31   :  { %644 = vmatprep.subr.bf16.mxu1 %v643_v30  ;;  %v88_v44 = vld [vmem:[#allocation4 + $0x130] sm:$0xff]  ;;  %v105_v47 = vld [vmem:[#allocation4 + $0x1b8] sm:$0xff]  ;;  %v107_v49 = vld [vmem:[#allocation4 + $0x1c8] sm:$0xff]  ;;  %v585_v50 = vpack.c.bf16 %v92_v42, %v86_v41 }
  0x32   :  { %v101_v48 = vld [vmem:[#allocation4 + $0x198] sm:$0xff]  ;;  %v649_v51 = vpack.c.bf16 %v94_v45, %v88_v44  ;;  %v587_v52 = vpack.c.bf16 %v105_v47, %v99_v46  ;;  %v98_v53 = vld [vmem:[#allocation4 + $0x180] sm:$0xff]  ;;  %v104_v54 = vld [vmem:[#allocation4 + $0x1b0] sm:$0xff] }
  0x33   :  { %582 = vmatpush1.bf16.msra.mxu0 %v581_v34  ;;  %v100_v55 = vld [vmem:[#allocation4 + $0x190] sm:$0xff]  ;;  %v651_v56 = vpack.c.bf16 %v107_v49, %v101_v48  ;;  %v106_v57 = vld [vmem:[#allocation4 + $0x1c0] sm:$0xff]  ;;  %v111_v58 = vld [vmem:[#allocation4 + $0x1e8] sm:$0xff]  ;;  %v589_v62 = vpack.c.bf16 %v104_v54, %v98_v53 }
  0x34   :  { %646 = vmatpush1.bf16.msra.mxu1 %v645_v38  ;;  %584 = vmatprep.subr.bf16.mxu0 %v583_v39  ;;  %v117_v59 = vld [vmem:[#allocation4 + $0x218] sm:$0xff]  ;;  %v119_v61 = vld [vmem:[#allocation4 + $0x228] sm:$0xff]  ;;  %v653_v63 = vpack.c.bf16 %v106_v57, %v100_v55  ;;  %v110_v1 = vld [vmem:[#allocation4 + $0x1e0] sm:$0xff] }
  0x35   :  { %648 = vmatprep.subr.bf16.mxu1 %v647_v43  ;;  %v113_v60 = vld [vmem:[#allocation4 + $0x1f8] sm:$0xff]  ;;  %v591_v0 = vpack.c.bf16 %v117_v59, %v111_v58  ;;  %v116_v2 = vld [vmem:[#allocation4 + $0x210] sm:$0xff]  ;;  %v118_v5 = vld [vmem:[#allocation4 + $0x220] sm:$0xff] }
  0x36   :  { %v112_v3 = vld [vmem:[#allocation4 + $0x1f0] sm:$0xff]  ;;  %v655_v4 = vpack.c.bf16 %v119_v61, %v113_v60  ;;  %v123_v6 = vld [vmem:[#allocation4 + $0x248] sm:$0xff]  ;;  %v129_v7 = vld [vmem:[#allocation4 + $0x278] sm:$0xff]  ;;  %v593_v10 = vpack.c.bf16 %v116_v2, %v110_v1 }
  0x37   :  { %586 = vmatpush1.bf16.msra.mxu0 %v585_v50  ;;  %v125_v8 = vld [vmem:[#allocation4 + $0x258] sm:$0xff]  ;;  %v131_v9 = vld [vmem:[#allocation4 + $0x288] sm:$0xff]  ;;  %v657_v11 = vpack.c.bf16 %v118_v5, %v112_v3  ;;  %v595_v12 = vpack.c.bf16 %v129_v7, %v123_v6  ;;  %v122_v13 = vld [vmem:[#allocation4 + $0x240] sm:$0xff] }
  0x38   :  { %650 = vmatpush1.bf16.msra.mxu1 %v649_v51  ;;  %588 = vmatprep.subr.bf16.mxu0 %v587_v52  ;;  %v128_v14 = vld [vmem:[#allocation4 + $0x270] sm:$0xff]  ;;  %v659_v16 = vpack.c.bf16 %v131_v9, %v125_v8  ;;  %v130_v17 = vld [vmem:[#allocation4 + $0x280] sm:$0xff]  ;;  %v135_v18 = vld [vmem:[#allocation4 + $0x2a8] sm:$0xff] }
  0x39   :  { %652 = vmatprep.subr.bf16.mxu1 %v651_v56  ;;  %v124_v15 = vld [vmem:[#allocation4 + $0x250] sm:$0xff]  ;;  %v141_v19 = vld [vmem:[#allocation4 + $0x2d8] sm:$0xff]  ;;  %v143_v21 = vld [vmem:[#allocation4 + $0x2e8] sm:$0xff]  ;;  %v597_v22 = vpack.c.bf16 %v128_v14, %v122_v13 }
  0x3a   :  { %v137_v20 = vld [vmem:[#allocation4 + $0x2b8] sm:$0xff]  ;;  %v661_v23 = vpack.c.bf16 %v130_v17, %v124_v15  ;;  %v599_v24 = vpack.c.bf16 %v141_v19, %v135_v18  ;;  %v134_v25 = vld [vmem:[#allocation4 + $0x2a0] sm:$0xff]  ;;  %v140_v26 = vld [vmem:[#allocation4 + $0x2d0] sm:$0xff] }
  0x3b   :  { %590 = vmatpush1.bf16.msra.mxu0 %v589_v62  ;;  %v136_v27 = vld [vmem:[#allocation4 + $0x2b0] sm:$0xff]  ;;  %v663_v28 = vpack.c.bf16 %v143_v21, %v137_v20  ;;  %v142_v29 = vld [vmem:[#allocation4 + $0x2e0] sm:$0xff]  ;;  %v147_v30 = vld [vmem:[#allocation4 + $0x308] sm:$0xff]  ;;  %v601_v34 = vpack.c.bf16 %v140_v26, %v134_v25 }
  0x3c   :  { %654 = vmatpush1.bf16.msra.mxu1 %v653_v63  ;;  %592 = vmatprep.subr.bf16.mxu0 %v591_v0  ;;  %v153_v31 = vld [vmem:[#allocation4 + $0x338] sm:$0xff]  ;;  %v155_v33 = vld [vmem:[#allocation4 + $0x348] sm:$0xff]  ;;  %v665_v35 = vpack.c.bf16 %v142_v29, %v136_v27  ;;  %v146_v37 = vld [vmem:[#allocation4 + $0x300] sm:$0xff] }
  0x3d   :  { %656 = vmatprep.subr.bf16.mxu1 %v655_v4  ;;  %v149_v32 = vld [vmem:[#allocation4 + $0x318] sm:$0xff]  ;;  %v603_v36 = vpack.c.bf16 %v153_v31, %v147_v30  ;;  %v152_v38 = vld [vmem:[#allocation4 + $0x330] sm:$0xff]  ;;  %v154_v41 = vld [vmem:[#allocation4 + $0x340] sm:$0xff] }
  0x3e   :  { %v148_v39 = vld [vmem:[#allocation4 + $0x310] sm:$0xff]  ;;  %v667_v40 = vpack.c.bf16 %v155_v33, %v149_v32  ;;  %v159_v42 = vld [vmem:[#allocation4 + $0x368] sm:$0xff]  ;;  %v165_v43 = vld [vmem:[#allocation4 + $0x398] sm:$0xff]  ;;  %v605_v46 = vpack.c.bf16 %v152_v38, %v146_v37 }
  0x3f   :  { %594 = vmatpush1.bf16.msra.mxu0 %v593_v10  ;;  %v161_v44 = vld [vmem:[#allocation4 + $0x378] sm:$0xff]  ;;  %v167_v45 = vld [vmem:[#allocation4 + $0x3a8] sm:$0xff]  ;;  %v669_v47 = vpack.c.bf16 %v154_v41, %v148_v39  ;;  %v607_v48 = vpack.c.bf16 %v165_v43, %v159_v42  ;;  %v158_v49 = vld [vmem:[#allocation4 + $0x360] sm:$0xff] }
  0x40   :  { %658 = vmatpush1.bf16.msra.mxu1 %v657_v11  ;;  %596 = vmatprep.subr.bf16.mxu0 %v595_v12  ;;  %v164_v50 = vld [vmem:[#allocation4 + $0x390] sm:$0xff]  ;;  %v671_v52 = vpack.c.bf16 %v167_v45, %v161_v44  ;;  %v166_v53 = vld [vmem:[#allocation4 + $0x3a0] sm:$0xff]  ;;  %v171_v54 = vld [vmem:[#allocation4 + $0x3c8] sm:$0xff] }
  0x41   :  { %660 = vmatprep.subr.bf16.mxu1 %v659_v16  ;;  %v160_v51 = vld [vmem:[#allocation4 + $0x370] sm:$0xff]  ;;  %v177_v55 = vld [vmem:[#allocation4 + $0x3f8] sm:$0xff]  ;;  %v179_v57 = vld [vmem:[#allocation4 + $0x408] sm:$0xff]  ;;  %v609_v58 = vpack.c.bf16 %v164_v50, %v158_v49 }
  0x42   :  { %v173_v56 = vld [vmem:[#allocation4 + $0x3d8] sm:$0xff]  ;;  %v673_v59 = vpack.c.bf16 %v166_v53, %v160_v51  ;;  %v611_v60 = vpack.c.bf16 %v177_v55, %v171_v54  ;;  %v170_v61 = vld [vmem:[#allocation4 + $0x3c0] sm:$0xff]  ;;  %v176_v62 = vld [vmem:[#allocation4 + $0x3f0] sm:$0xff] }
  0x43   :  { %598 = vmatpush1.bf16.msra.mxu0 %v597_v22  ;;  %v172_v63 = vld [vmem:[#allocation4 + $0x3d0] sm:$0xff]  ;;  %v675_v0 = vpack.c.bf16 %v179_v57, %v173_v56  ;;  %v178_v1 = vld [vmem:[#allocation4 + $0x400] sm:$0xff]  ;;  %v183_v2 = vld [vmem:[#allocation4 + $0x428] sm:$0xff]  ;;  %v613_v6 = vpack.c.bf16 %v176_v62, %v170_v61 }
  0x44   :  { %662 = vmatpush1.bf16.msra.mxu1 %v661_v23  ;;  %600 = vmatprep.subr.bf16.mxu0 %v599_v24  ;;  %v189_v3 = vld [vmem:[#allocation4 + $0x458] sm:$0xff]  ;;  %v191_v5 = vld [vmem:[#allocation4 + $0x468] sm:$0xff]  ;;  %v182_v7 = vld [vmem:[#allocation4 + $0x420] sm:$0xff]  ;;  %v677_v8 = vpack.c.bf16 %v178_v1, %v172_v63 }
  0x45   :  { %664 = vmatprep.subr.bf16.mxu1 %v663_v28  ;;  %v185_v4 = vld [vmem:[#allocation4 + $0x438] sm:$0xff]  ;;  %v615_v9 = vpack.c.bf16 %v189_v3, %v183_v2  ;;  %v188_v10 = vld [vmem:[#allocation4 + $0x450] sm:$0xff]  ;;  %v190_v12 = vld [vmem:[#allocation4 + $0x460] sm:$0xff] }
  0x46   :  { %v184_v11 = vld [vmem:[#allocation4 + $0x430] sm:$0xff]  ;;  %v679_v13 = vpack.c.bf16 %v191_v5, %v185_v4  ;;  %v195_v14 = vld [vmem:[#allocation4 + $0x488] sm:$0xff]  ;;  %v201_v15 = vld [vmem:[#allocation4 + $0x4b8] sm:$0xff]  ;;  %v617_v19 = vpack.c.bf16 %v188_v10, %v182_v7 }
  0x47   :  { %602 = vmatpush1.bf16.msra.mxu0 %v601_v34  ;;  %v899_v16 = vld [vmem:[#allocation2 + $0x8] sm:$0xff]  ;;  %v197_v17 = vld [vmem:[#allocation4 + $0x498] sm:$0xff]  ;;  %v681_v20 = vpack.c.bf16 %v190_v12, %v184_v11  ;;  %v619_v21 = vpack.c.bf16 %v201_v15, %v195_v14  ;;  %v194_v22 = vld [vmem:[#allocation4 + $0x480] sm:$0xff] }
  0x48   :  { %666 = vmatpush1.bf16.msra.mxu1 %v665_v35  ;;  %604 = vmatprep.subr.bf16.mxu0 %v603_v36  ;;  %v203_v18 = vld [vmem:[#allocation4 + $0x4c8] sm:$0xff]  ;;  %v200_v23 = vld [vmem:[#allocation4 + $0x4b0] sm:$0xff]  ;;  %v202_v26 = vld [vmem:[#allocation4 + $0x4c0] sm:$0xff] }
  0x49   :  { %668 = vmatprep.subr.bf16.mxu1 %v667_v40  ;;  %338 = vmatprep.mubr.f32.mxu0 %v899_v16  ;;  %v196_v24 = vld [vmem:[#allocation4 + $0x490] sm:$0xff]  ;;  %v683_v25 = vpack.c.bf16 %v203_v18, %v197_v17  ;;  %v207_v27 = vld [vmem:[#allocation4 + $0x4e8] sm:$0xff]  ;;  %v213_v28 = vld [vmem:[#allocation4 + $0x518] sm:$0xff]  ;;  %v621_v31 = vpack.c.bf16 %v200_v23, %v194_v22 }
  0x4a   :  { %427 = vmatprep.mubr.f32.mxu1 %v899_v16  ;;  %v209_v29 = vld [vmem:[#allocation4 + $0x4f8] sm:$0xff]  ;;  %v215_v30 = vld [vmem:[#allocation4 + $0x528] sm:$0xff]  ;;  %v685_v32 = vpack.c.bf16 %v202_v26, %v196_v24  ;;  %v623_v33 = vpack.c.bf16 %v213_v28, %v207_v27  ;;  %v206_v34 = vld [vmem:[#allocation4 + $0x4e0] sm:$0xff] }
  0x4b   :  { %606 = vmatpush1.bf16.msra.mxu0 %v605_v46  ;;  %v212_v35 = vld [vmem:[#allocation4 + $0x510] sm:$0xff]  ;;  %v687_v37 = vpack.c.bf16 %v215_v30, %v209_v29  ;;  %v214_v38 = vld [vmem:[#allocation4 + $0x520] sm:$0xff]  ;;  %v219_v39 = vld [vmem:[#allocation4 + $0x548] sm:$0xff] }
  0x4c   :  { %670 = vmatpush1.bf16.msra.mxu1 %v669_v47  ;;  %608 = vmatprep.subr.bf16.mxu0 %v607_v48  ;;  %v208_v36 = vld [vmem:[#allocation4 + $0x4f0] sm:$0xff]  ;;  %v225_v40 = vld [vmem:[#allocation4 + $0x578] sm:$0xff]  ;;  %v227_v42 = vld [vmem:[#allocation4 + $0x588] sm:$0xff]  ;;  %v625_v43 = vpack.c.bf16 %v212_v35, %v206_v34 }
  0x4d   :  { %672 = vmatprep.subr.bf16.mxu1 %v671_v52  ;;  %v221_v41 = vld [vmem:[#allocation4 + $0x558] sm:$0xff]  ;;  %v689_v44 = vpack.c.bf16 %v214_v38, %v208_v36  ;;  %v627_v45 = vpack.c.bf16 %v225_v40, %v219_v39  ;;  %v218_v46 = vld [vmem:[#allocation4 + $0x540] sm:$0xff]  ;;  %v224_v47 = vld [vmem:[#allocation4 + $0x570] sm:$0xff] }
  0x4e   :  { %v220_v48 = vld [vmem:[#allocation4 + $0x550] sm:$0xff]  ;;  %v691_v49 = vpack.c.bf16 %v227_v42, %v221_v41  ;;  %v226_v50 = vld [vmem:[#allocation4 + $0x580] sm:$0xff]  ;;  %v231_v51 = vld [vmem:[#allocation4 + $0x5a8] sm:$0xff]  ;;  %v629_v55 = vpack.c.bf16 %v224_v47, %v218_v46 }
  0x4f   :  { %610 = vmatpush1.bf16.msra.mxu0 %v609_v58  ;;  %v237_v52 = vld [vmem:[#allocation4 + $0x5d8] sm:$0xff]  ;;  %v239_v54 = vld [vmem:[#allocation4 + $0x5e8] sm:$0xff]  ;;  %v693_v56 = vpack.c.bf16 %v226_v50, %v220_v48  ;;  %v230_v58 = vld [vmem:[#allocation4 + $0x5a0] sm:$0xff] }
  0x50   :  { %674 = vmatpush1.bf16.msra.mxu1 %v673_v59  ;;  %612 = vmatprep.subr.bf16.mxu0 %v611_v60  ;;  %v233_v53 = vld [vmem:[#allocation4 + $0x5b8] sm:$0xff]  ;;  %v631_v57 = vpack.c.bf16 %v237_v52, %v231_v51  ;;  %v236_v59 = vld [vmem:[#allocation4 + $0x5d0] sm:$0xff]  ;;  %v238_v62 = vld [vmem:[#allocation4 + $0x5e0] sm:$0xff] }
  0x51   :  { %676 = vmatprep.subr.bf16.mxu1 %v675_v0  ;;  %v232_v60 = vld [vmem:[#allocation4 + $0x5b0] sm:$0xff]  ;;  %v695_v61 = vpack.c.bf16 %v239_v54, %v233_v53  ;;  %v55_v63 = vld [vmem:[#allocation4 + $0x28] sm:$0xff]  ;;  %v61_v0 = vld [vmem:[#allocation4 + $0x58] sm:$0xff]  ;;  %v633_v1 = vpack.c.bf16 %v236_v59, %v230_v58 }
  0x52   :  { %v697_v2 = vpack.c.bf16 %v238_v62, %v232_v60  ;;  %v699_v3 = vpack.c.bf16 %v61_v0, %v55_v63  ;;  %v54_v4 = vld [vmem:[#allocation4 + $0x20] sm:$0xff]  ;;  %v60_v5 = vld [vmem:[#allocation4 + $0x50] sm:$0xff]  ;;  %v73_v7 = vld [vmem:[#allocation4 + $0xb8] sm:$0xff] }
  0x53   :  { %614 = vmatpush1.bf16.msra.mxu0 %v613_v6  ;;  %v67_v6 = vld [vmem:[#allocation4 + $0x88] sm:$0xff]  ;;  %v66_v11 = vld [vmem:[#allocation4 + $0x80] sm:$0xff]  ;;  %v72_v12 = vld [vmem:[#allocation4 + $0xb0] sm:$0xff] }
  0x54   :  { %678 = vmatpush1.bf16.msra.mxu1 %v677_v8  ;;  %616 = vmatprep.subr.bf16.mxu0 %v615_v9  ;;  %v903_v8 = vld [vmem:[#allocation2] sm:$0xff]  ;;  %v701_v9 = vpack.c.bf16 %v60_v5, %v54_v4  ;;  %v703_v10 = vpack.c.bf16 %v73_v7, %v67_v6  ;;  %v85_v14 = vld [vmem:[#allocation4 + $0x118] sm:$0xff]  ;;  %v705_v17 = vpack.c.bf16 %v72_v12, %v66_v11  ;;  %v909_v18 = vld [vmem:[#allocation2 + $0x10] sm:$0xff] }
  0x55   :  { %680 = vmatprep.subr.bf16.mxu1 %v679_v13  ;;  %v79_v13 = vld [vmem:[#allocation4 + $0xe8] sm:$0xff]  ;;  %v906_v15 = vld [vmem:[#allocation2 + $0x18] sm:$0xff]  ;;  %v915_v26 = vld [vmem:[#allocation2 + $0x20] sm:$0xff] }
  0x56   :  { %v91_v22 = vld [vmem:[#allocation4 + $0x148] sm:$0xff]  ;;  %v97_v23 = vld [vmem:[#allocation4 + $0x178] sm:$0xff]  ;;  %v90_v28 = vld [vmem:[#allocation4 + $0x140] sm:$0xff] }
  0x57   :  { %618 = vmatpush1.bf16.msra.mxu0 %v617_v19  ;;  %v707_v19 = vpack.c.bf16 %v85_v14, %v79_v13  ;;  %v47_v24 = vld [vmem:[#allocation2 + $0x28] sm:$0xff]  ;;  %v711_v27 = vpack.c.bf16 %v97_v23, %v91_v22  ;;  %v96_v29 = vld [vmem:[#allocation4 + $0x170] sm:$0xff]  ;;  %v102_v36 = vld [vmem:[#allocation4 + $0x1a0] sm:$0xff] }
  0x58   :  { %682 = vmatpush1.bf16.msra.mxu1 %v681_v20  ;;  %620 = vmatprep.subr.bf16.mxu0 %v619_v21  ;;  %v78_v20 = vld [vmem:[#allocation4 + $0xe0] sm:$0xff]  ;;  %v84_v21 = vld [vmem:[#allocation4 + $0x110] sm:$0xff]  ;;  %v103_v30 = vld [vmem:[#allocation4 + $0x1a8] sm:$0xff] }
  0x59   :  { %684 = vmatprep.subr.bf16.mxu1 %v683_v25  ;;  %v709_v25 = vpack.c.bf16 %v84_v21, %v78_v20  ;;  %v921_v34 = vld [vmem:[#allocation2 + $0x30] sm:$0xff]  ;;  %v115_v38 = vld [vmem:[#allocation4 + $0x208] sm:$0xff]  ;;  %v121_v39 = vld [vmem:[#allocation4 + $0x238] sm:$0xff] }
  0x5a   :  { %v719_v41 = vpack.c.bf16 %v121_v39, %v115_v38  ;;  %v114_v42 = vld [vmem:[#allocation4 + $0x200] sm:$0xff]  ;;  %v139_v50 = vld [vmem:[#allocation4 + $0x2c8] sm:$0xff]  ;;  %v145_v51 = vld [vmem:[#allocation4 + $0x2f8] sm:$0xff] }
  0x5b   :  { %622 = vmatpush1.bf16.msra.mxu0 %v621_v31  ;;  %v109_v31 = vld [vmem:[#allocation4 + $0x1d8] sm:$0xff]  ;;  %v126_v48 = vld [vmem:[#allocation4 + $0x260] sm:$0xff]  ;;  %v727_v53 = vpack.c.bf16 %v145_v51, %v139_v50  ;;  %v156_v60 = vld [vmem:[#allocation4 + $0x350] sm:$0xff] }
  0x5c   :  { %686 = vmatpush1.bf16.msra.mxu1 %v685_v32  ;;  %624 = vmatprep.subr.bf16.mxu0 %v623_v33  ;;  %v918_v32 = vld [vmem:[#allocation2 + $0x38] sm:$0xff]  ;;  %v713_v33 = vpack.c.bf16 %v96_v29, %v90_v28  ;;  %v715_v35 = vpack.c.bf16 %v109_v31, %v103_v30  ;;  %v138_v54 = vld [vmem:[#allocation4 + $0x2c0] sm:$0xff]  ;;  %v216_v31 = vld [vmem:[#allocation4 + $0x530] sm:$0xff] }
  0x5d   :  { %688 = vmatprep.subr.bf16.mxu1 %v687_v37  ;;  %v108_v37 = vld [vmem:[#allocation4 + $0x1d0] sm:$0xff]  ;;  %v150_v59 = vld [vmem:[#allocation4 + $0x320] sm:$0xff]  ;;  %v169_v62 = vld [vmem:[#allocation4 + $0x3b8] sm:$0xff] }
  0x5e   :  { %v717_v40 = vpack.c.bf16 %v108_v37, %v102_v36  ;;  %v733_v63 = vpack.c.bf16 %v156_v60, %v150_v59  ;;  %v181_v4 = vld [vmem:[#allocation4 + $0x418] sm:$0xff]  ;;  %v174_v7 = vld [vmem:[#allocation4 + $0x3e0] sm:$0xff]  ;;  %v228_v39 = vld [vmem:[#allocation4 + $0x590] sm:$0xff] }
  0x5f   :  { %626 = vmatpush1.bf16.msra.mxu0 %v625_v43  ;;  %v120_v43 = vld [vmem:[#allocation4 + $0x230] sm:$0xff]  ;;  %v193_v11 = vld [vmem:[#allocation4 + $0x478] sm:$0xff]  ;;  %v186_v14 = vld [vmem:[#allocation4 + $0x440] sm:$0xff] }
  0x60   :  { %690 = vmatpush1.bf16.msra.mxu1 %v689_v44  ;;  %628 = vmatprep.subr.bf16.mxu0 %v627_v45  ;;  %v127_v44 = vld [vmem:[#allocation4 + $0x268] sm:$0xff]  ;;  %v133_v45 = vld [vmem:[#allocation4 + $0x298] sm:$0xff]  ;;  %v721_v46 = vpack.c.bf16 %v120_v43, %v114_v42  ;;  %v198_v23 = vld [vmem:[#allocation4 + $0x4a0] sm:$0xff] }
  0x61   :  { %692 = vmatprep.subr.bf16.mxu1 %v691_v49  ;;  %v723_v47 = vpack.c.bf16 %v133_v45, %v127_v44  ;;  %v132_v49 = vld [vmem:[#allocation4 + $0x290] sm:$0xff]  ;;  %v205_v20 = vld [vmem:[#allocation4 + $0x4d8] sm:$0xff]  ;;  %v210_v30 = vld [vmem:[#allocation4 + $0x500] sm:$0xff] }
  0x62   :  { %v725_v52 = vpack.c.bf16 %v132_v49, %v126_v48  ;;  %v753_v36 = vpack.c.bf16 %v216_v31, %v210_v30  ;;  %v222_v38 = vld [vmem:[#allocation4 + $0x560] sm:$0xff]  ;;  %v240_v45 = vld [vmem:[#allocation4 + $0x5f0] sm:$0xff] }
  0x63   :  { %630 = vmatpush1.bf16.msra.mxu0 %v629_v55  ;;  %v144_v55 = vld [vmem:[#allocation4 + $0x2f0] sm:$0xff]  ;;  %v757_v42 = vpack.c.bf16 %v228_v39, %v222_v38  ;;  %v234_v44 = vld [vmem:[#allocation4 + $0x5c0] sm:$0xff] }
  0x64   :  { %694 = vmatpush1.bf16.msra.mxu1 %v693_v56  ;;  %632 = vmatprep.subr.bf16.mxu0 %v631_v57  ;;  %v157_v56 = vld [vmem:[#allocation4 + $0x358] sm:$0xff]  ;;  %v729_v57 = vpack.c.bf16 %v144_v55, %v138_v54  ;;  %v242_v50 = vld [vmem:[%s1011_s2] sm:$0x3f] }
  0x65   :  { %696 = vmatprep.subr.bf16.mxu1 %v695_v61  ;;  %v163_v61 = vld [vmem:[#allocation4 + $0x388] sm:$0xff] }
  0x66   :  { %v735_v0 = vpack.c.bf16 %v169_v62, %v163_v61 }
  0x67   :  { %634 = vmatpush1.bf16.msra.mxu0 %v633_v1  ;;  %v162_v1 = vld [vmem:[#allocation4 + $0x380] sm:$0xff] }
  0x68   :  { %698 = vmatpush1.bf16.msra.mxu1 %v697_v2  ;;  %700 = vmatprep.subr.bf16.mxu0 %v699_v3  ;;  %v168_v2 = vld [vmem:[#allocation4 + $0x3b0] sm:$0xff] }
  0x69   :  { %763 = vmatprep.subr.bf16.mxu1 %v699_v3  ;;  %v175_v3 = vld [vmem:[#allocation4 + $0x3e8] sm:$0xff]  ;;  %v737_v5 = vpack.c.bf16 %v168_v2, %v162_v1 }
  0x6a   :  { %339 = vmatmul.mubr.f32.vlgmr.msra.gmra.mrb[0].mxu0 %v903_v8  ;;  %v739_v6 = vpack.c.bf16 %v181_v4, %v175_v3 }
  0x6b   :  { %428 = vmatmul.mubr.f32.vlgmr.msra.gmra.mrb[0].mxu1 %v903_v8  ;;  %702 = vmatpush1.bf16.msra.mxu0 %v701_v9 }
  0x6c   :  { %779 = vmatpush1.bf16.msra.mxu1 %v701_v9  ;;  %704 = vmatprep.subr.bf16.mxu0 %v703_v10  ;;  %v180_v9 = vld [vmem:[#allocation4 + $0x410] sm:$0xff] }
  0x6d   :  { %764 = vmatprep.subr.bf16.mxu1 %v703_v10  ;;  %344 = vmatprep.mubr.f32.mxu0 %v906_v15  ;;  %v187_v10 = vld [vmem:[#allocation4 + $0x448] sm:$0xff]  ;;  %v741_v12 = vpack.c.bf16 %v180_v9, %v174_v7 }
  0x6e   :  { %433 = vmatprep.mubr.f32.mxu1 %v906_v15  ;;  %345 = vmatmul.mubr.f32.gmra.mrb[2].mxu0 %v909_v18  ;;  %v743_v13 = vpack.c.bf16 %v193_v11, %v187_v10 }
  0x6f   :  { %706 = vmatpush1.bf16.msra.mxu0 %v705_v17  ;;  %434 = vmatmul.mubr.f32.gmra.mrb[2].mxu1 %v909_v18 }
  0x70   :  { %780 = vmatpush1.bf16.msra.mxu1 %v705_v17  ;;  %708 = vmatprep.subr.bf16.mxu0 %v707_v19  ;;  %v192_v17 = vld [vmem:[#allocation4 + $0x470] sm:$0xff] }
  0x71   :  { %765 = vmatprep.subr.bf16.mxu1 %v707_v19  ;;  %350 = vmatprep.mubr.f32.mxu0 %v47_v24  ;;  %v199_v19 = vld [vmem:[#allocation4 + $0x4a8] sm:$0xff]  ;;  %v745_v21 = vpack.c.bf16 %v192_v17, %v186_v14 }
  0x72   :  { %439 = vmatprep.mubr.f32.mxu1 %v47_v24  ;;  %351 = vmatmul.mubr.f32.gmra.mrb[4].mxu0 %v915_v26  ;;  %v747_v22 = vpack.c.bf16 %v205_v20, %v199_v19 }
  0x73   :  { %710 = vmatpush1.bf16.msra.mxu0 %v709_v25  ;;  %440 = vmatmul.mubr.f32.gmra.mrb[4].mxu1 %v915_v26 }
  0x74   :  { %781 = vmatpush1.bf16.msra.mxu1 %v709_v25  ;;  %712 = vmatprep.subr.bf16.mxu0 %v711_v27  ;;  %v211_v25 = vld [vmem:[#allocation4 + $0x508] sm:$0xff] }
  0x75   :  { %766 = vmatprep.subr.bf16.mxu1 %v711_v27  ;;  %356 = vmatprep.mubr.f32.mxu0 %v918_v32  ;;  %v217_v27 = vld [vmem:[#allocation4 + $0x538] sm:$0xff] }
  0x76   :  { %445 = vmatprep.mubr.f32.mxu1 %v918_v32  ;;  %357 = vmatmul.mubr.f32.gmra.mrb[6].mxu0 %v921_v34  ;;  %v751_v29 = vpack.c.bf16 %v217_v27, %v211_v25 }
  0x77   :  { %714 = vmatpush1.bf16.msra.mxu0 %v713_v33  ;;  %446 = vmatmul.mubr.f32.gmra.mrb[6].mxu1 %v921_v34 }
  0x78   :  { %782 = vmatpush1.bf16.msra.mxu1 %v713_v33  ;;  %716 = vmatprep.subr.bf16.mxu0 %v715_v35  ;;  %v223_v33 = vld [vmem:[#allocation4 + $0x568] sm:$0xff] }
  0x79   :  { %767 = vmatprep.subr.bf16.mxu1 %v715_v35  ;;  %516 = vmatprep.mubr.f32.mxu0 %v899_v16  ;;  %v151_v16 = vld [vmem:[#allocation4 + $0x328] sm:$0xff]  ;;  %v229_v35 = vld [vmem:[#allocation4 + $0x598] sm:$0xff] }
  0x7a   :  { %528 = vmatprep.mubr.f32.mxu1 %v47_v24  ;;  %v731_v58 = vpack.c.bf16 %v157_v56, %v151_v16  ;;  %v204_v24 = vld [vmem:[#allocation4 + $0x4d0] sm:$0xff]  ;;  %v755_v37 = vpack.c.bf16 %v229_v35, %v223_v33 }
  0x7b   :  { %718 = vmatpush1.bf16.msra.mxu0 %v717_v40  ;;  %v749_v28 = vpack.c.bf16 %v204_v24, %v198_v23 }
  0x7c   :  { %783 = vmatpush1.bf16.msra.mxu1 %v717_v40  ;;  %720 = vmatprep.subr.bf16.mxu0 %v719_v41  ;;  %v235_v40 = vld [vmem:[#allocation4 + $0x5c8] sm:$0xff] }
  0x7d   :  { %768 = vmatprep.subr.bf16.mxu1 %v719_v41  ;;  %v241_v41 = vld [vmem:[#allocation4 + $0x5f8] sm:$0xff] }
  0x7e   :  { %v759_v43 = vpack.c.bf16 %v241_v41, %v235_v40 }
  0x7f   :  { %722 = vmatpush1.bf16.msra.mxu0 %v721_v46 }
  0x80   :  { %784 = vmatpush1.bf16.msra.mxu1 %v721_v46  ;;  %724 = vmatprep.subr.bf16.mxu0 %v723_v47  ;;  %v761_v46 = vpack.c.bf16 %v240_v45, %v234_v44 }
  0x81   :  { %769 = vmatprep.subr.bf16.mxu1 %v723_v47  ;;  %v244_v47 = vlaneseq }
  0x83   :  { %726 = vmatpush1.bf16.msra.mxu0 %v725_v52  ;;  %v245_v48 = vshrl.u32 %v244_v47, 7 }
  0x84   :  { %785 = vmatpush1.bf16.msra.mxu1 %v725_v52  ;;  %728 = vmatprep.subr.bf16.mxu0 %v727_v53 }
  0x85   :  { %770 = vmatprep.subr.bf16.mxu1 %v727_v53  ;;  %v246_v49 = vsub.s32 0, %v245_v48  ;;  %v254_v51 = vsub.s32 2, %v245_v48  ;;  %v250_v52 = vsub.s32 1, %v245_v48  ;;  %v262_v23 = vsub.s32 4, %v245_v48 }
  0x86   :  { %v266_v24 = vsub.s32 5, %v245_v48 }
  0x87   :  { %730 = vmatpush1.bf16.msra.mxu0 %v729_v57  ;;  %v247_v53 = vrot.slane %v242_v50, %v246_v49  ;;  %v251_v54 = vrot.slane %v242_v50, %v250_v52  ;;  %v263_v25 = vrot.slane %v242_v50, %v262_v23 }
  0x88   :  { %786 = vmatpush1.bf16.msra.mxu1 %v729_v57  ;;  %732 = vmatprep.subr.bf16.mxu0 %v731_v58  ;;  %v267_v27 = vrot.slane %v242_v50, %v266_v24 }
  0x89   :  { %771 = vmatprep.subr.bf16.mxu1 %v731_v58 }
  0x8b   :  { %734 = vmatpush1.bf16.msra.mxu0 %v733_v63 }
  0x8c   :  { %787 = vmatpush1.bf16.msra.mxu1 %v733_v63  ;;  %736 = vmatprep.subr.bf16.mxu0 %v735_v0 }
  0x8d   :  { %772 = vmatprep.subr.bf16.mxu1 %v735_v0 }
  0x8f   :  { %738 = vmatpush1.bf16.msra.mxu0 %v737_v5 }
  0x90   :  { %788 = vmatpush1.bf16.msra.mxu1 %v737_v5  ;;  %740 = vmatprep.subr.bf16.mxu0 %v739_v6 }
  0x91   :  { %773 = vmatprep.subr.bf16.mxu1 %v739_v6 }
  0x93   :  { %742 = vmatpush1.bf16.msra.mxu0 %v741_v12 }
  0x94   :  { %789 = vmatpush1.bf16.msra.mxu1 %v741_v12  ;;  %744 = vmatprep.subr.bf16.mxu0 %v743_v13 }
  0x95   :  { %774 = vmatprep.subr.bf16.mxu1 %v743_v13 }
  0x97   :  { %746 = vmatpush1.bf16.msra.mxu0 %v745_v21 }
  0x98   :  { %790 = vmatpush1.bf16.msra.mxu1 %v745_v21  ;;  %748 = vmatprep.subr.bf16.mxu0 %v747_v22 }
  0x99   :  { %775 = vmatprep.subr.bf16.mxu1 %v747_v22 }
  0x9b   :  { %750 = vmatpush1.bf16.msra.mxu0 %v749_v28 }
  0x9c   :  { %791 = vmatpush1.bf16.msra.mxu1 %v749_v28  ;;  %752 = vmatprep.subr.bf16.mxu0 %v751_v29 }
  0x9d   :  { %776 = vmatprep.subr.bf16.mxu1 %v751_v29 }
  0x9f   :  { %754 = vmatpush1.bf16.msra.mxu0 %v753_v36 }
  0xa0   :  { %792 = vmatpush1.bf16.msra.mxu1 %v753_v36  ;;  %756 = vmatprep.subr.bf16.mxu0 %v755_v37 }
  0xa1   :  { %777 = vmatprep.subr.bf16.mxu1 %v755_v37 }
  0xa3   :  { %758 = vmatpush1.bf16.msra.mxu0 %v757_v42 }
  0xa4   :  { %793 = vmatpush1.bf16.msra.mxu1 %v757_v42  ;;  %760 = vmatprep.subr.bf16.mxu0 %v759_v43 }
  0xa5   :  { %778 = vmatprep.subr.bf16.mxu1 %v759_v43 }
  0xa7   :  { %762 = vmatpush1.bf16.msra.mxu0 %v761_v46 }
  0xa8   :  { %794 = vmatpush1.bf16.msra.mxu1 %v761_v46 }
  0xaa   :  { %517 = vmatmul.mubr.f32.vlgmr.msra.gmra.mrb[8].mxu0 %v903_v8  ;;  %v258_v8 = vsub.s32 3, %v245_v48 }
  0xab   :  { %529 = vmatmul.mubr.f32.vlgmr.msra.gmra.mrb[8].mxu1 %v915_v26  ;;  %522 = vmatprep.mubr.f32.mxu0 %v906_v15  ;;  %v255_v26 = vrot.slane %v242_v50, %v254_v51 }
  0xac   :  { %534 = vmatprep.mubr.f32.mxu1 %v918_v32  ;;  %v259_v15 = vrot.slane %v242_v50, %v258_v8 }
  0xae   :  { %523 = vmatmul.mubr.f32.gmra.mrb[10].mxu0 %v909_v18 }
  0xaf   :  { %535 = vmatmul.mubr.f32.gmra.mrb[10].mxu1 %v921_v34 }
 0x13d   :  { %v340_v55 = vpop.f32.mrb[0].mxu0 }
 0x13e   :  { %v341_v32 = vadd.f32 %v340_v55, %v247_v53  ;;  %v429_v16 = vpop.f32.mrb[0].mxu1  ;;  %v342_v18 = vpop.f32.mrb[1].mxu0 }
 0x13f   :  { %v430_v56 = vadd.f32 %v429_v16, %v255_v26  ;;  %v343_v34 = vadd.f32 %v342_v18, %v251_v54  ;;  %v431_v57 = vpop.f32.mrb[1].mxu1 }
 0x140   :  { %541 = vst [vmem:[%s1012_s3] sm:$0xff] %v341_v32  ;;  %v432_v58 = vadd.f32 %v431_v57, %v259_v15 }
 0x141   :  { %543 = vst [vmem:[%s1012_s3 + $0x10] sm:$0xff] %v430_v56  ;;  %542 = vst [vmem:[%s1012_s3 + $0x8] sm:$0xff] %v343_v34  ;;  %v346_v59 = vpop.f32.mrb[2].mxu0 }
 0x142   :  { %544 = vst [vmem:[%s1012_s3 + $0x18] sm:$0xff] %v432_v58  ;;  %v347_v60 = vadd.f32 %v346_v59, %v247_v53  ;;  %v435_v61 = vpop.f32.mrb[2].mxu1  ;;  %v348_v62 = vpop.f32.mrb[3].mxu0 }
 0x143   :  { %v436_v63 = vadd.f32 %v435_v61, %v255_v26  ;;  %v349_v0 = vadd.f32 %v348_v62, %v251_v54  ;;  %v437_v1 = vpop.f32.mrb[3].mxu1 }
 0x144   :  { %547 = vst [vmem:[%s1012_s3 + $0x30] sm:$0xff] %v347_v60  ;;  %v438_v2 = vadd.f32 %v437_v1, %v259_v15 }
 0x145   :  { %549 = vst [vmem:[%s1012_s3 + $0x40] sm:$0xff] %v436_v63  ;;  %548 = vst [vmem:[%s1012_s3 + $0x38] sm:$0xff] %v349_v0  ;;  %v352_v3 = vpop.f32.mrb[4].mxu0 }
 0x146   :  { %550 = vst [vmem:[%s1012_s3 + $0x48] sm:$0xff] %v438_v2  ;;  %v353_v4 = vadd.f32 %v352_v3, %v247_v53  ;;  %v441_v5 = vpop.f32.mrb[4].mxu1  ;;  %v354_v6 = vpop.f32.mrb[5].mxu0 }
 0x147   :  { %v442_v7 = vadd.f32 %v441_v5, %v255_v26  ;;  %v355_v9 = vadd.f32 %v354_v6, %v251_v54  ;;  %v443_v10 = vpop.f32.mrb[5].mxu1 }
 0x148   :  { %553 = vst [vmem:[%s1012_s3 + $0x60] sm:$0xff] %v353_v4  ;;  %v444_v11 = vadd.f32 %v443_v10, %v259_v15 }
 0x149   :  { %555 = vst [vmem:[%s1012_s3 + $0x70] sm:$0xff] %v442_v7  ;;  %554 = vst [vmem:[%s1012_s3 + $0x68] sm:$0xff] %v355_v9  ;;  %v358_v12 = vpop.f32.mrb[6].mxu0 }
 0x14a   :  { %556 = vst [vmem:[%s1012_s3 + $0x78] sm:$0xff] %v444_v11  ;;  %v359_v13 = vadd.f32 %v358_v12, %v247_v53  ;;  %v447_v14 = vpop.f32.mrb[6].mxu1  ;;  %v360_v17 = vpop.f32.mrb[7].mxu0 }
 0x14b   :  { %v448_v19 = vadd.f32 %v447_v14, %v255_v26  ;;  %v361_v20 = vadd.f32 %v360_v17, %v251_v54  ;;  %v449_v21 = vpop.f32.mrb[7].mxu1 }
 0x14c   :  { %559 = vst [vmem:[%s1012_s3 + $0x90] sm:$0xff] %v359_v13  ;;  %v450_v22 = vadd.f32 %v449_v21, %v259_v15 }
 0x14d   :  { %561 = vst [vmem:[%s1012_s3 + $0xa0] sm:$0xff] %v448_v19  ;;  %560 = vst [vmem:[%s1012_s3 + $0x98] sm:$0xff] %v361_v20 }
 0x14e   :  { %562 = vst [vmem:[%s1012_s3 + $0xa8] sm:$0xff] %v450_v22 }
 0x17d   :  { %v518_v28 = vpop.f32.mrb[8].mxu0 }
 0x17e   :  { %v519_v29 = vadd.f32 %v518_v28, %v263_v25  ;;  %v530_v30 = vpop.f32.mrb[8].mxu1  ;;  %v520_v31 = vpop.f32.mrb[9].mxu0 }
 0x17f   :  { %v531_v33 = vadd.f32 %v530_v30, %v263_v25  ;;  %v521_v35 = vadd.f32 %v520_v31, %v267_v27  ;;  %v532_v36 = vpop.f32.mrb[9].mxu1 }
 0x180   :  { %545 = vst [vmem:[%s1012_s3 + $0x20] sm:$0xff] %v519_v29  ;;  %v533_v37 = vadd.f32 %v532_v36, %v267_v27 }
 0x181   :  { %557 = vst [vmem:[%s1012_s3 + $0x80] sm:$0xff] %v531_v33  ;;  %546 = vst [vmem:[%s1012_s3 + $0x28] sm:$0xff] %v521_v35  ;;  %v524_v38 = vpop.f32.mrb[10].mxu0 }
 0x182   :  { %558 = vst [vmem:[%s1012_s3 + $0x88] sm:$0xff] %v533_v37  ;;  %v525_v39 = vadd.f32 %v524_v38, %v263_v25  ;;  %v536_v40 = vpop.f32.mrb[10].mxu1  ;;  %v526_v41 = vpop.f32.mrb[11].mxu0 }
 0x183   :  { %v537_v42 = vadd.f32 %v536_v40, %v263_v25  ;;  %v527_v43 = vadd.f32 %v526_v41, %v267_v27  ;;  %v538_v44 = vpop.f32.mrb[11].mxu1 }
 0x184   :  { %551 = vst [vmem:[%s1012_s3 + $0x50] sm:$0xff] %v525_v39  ;;  %v539_v45 = vadd.f32 %v538_v44, %v267_v27 }
 0x185   :  { %563 = vst [vmem:[%s1012_s3 + $0xb0] sm:$0xff] %v537_v42  ;;  %552 = vst [vmem:[%s1012_s3 + $0x58] sm:$0xff] %v527_v43 }
 0x186   :  { %564 = vst [vmem:[%s1012_s3 + $0xb8] sm:$0xff] %v539_v45 }
 0x187   :  { %569 = vsyncpa [#allocation3], 1 }
 0x188   :  { %570 = vsyncpa [#allocation5], 1 }

// kernel: eva_attention_forward.3
= control target key start
LH: loop header
LB: loop body
LE: loop exit
PB: predicated region body
PF: predicated region fallthrough
CT: control target
= control target key end

     0   :  { %8 = vsyncpa [#allocation4], 0  ;;  %s2076_s0 = inlined_call_operand.vmem [shape: f32[2,16,768], index: 0, kind: input, shape index: {}]   ;;  %s2077_s1 = inlined_call_operand.vmem [shape: f32[256,256], index: 1, kind: input, shape index: {}]   ;;  %s2078_s2 = inlined_call_operand.vmem [shape: f32[1,256], index: 2, kind: input, shape index: {}]   ;;  %s2079_s3 = inlined_call_operand.hbm [shape: f32[2,16,256], index: 3, kind: output, shape index: {}]  }
   0x1   :  { %10 = vsyncpa [#allocation4 + $0x1], 0  ;;  %s1660_s12 = smov 0   ;;  %s1662_s13 = smov 0  }
   0x2   :  { %s1664_s14 = smov 0   ;;  %s1666_s15 = smov 0  }
   0x3 LB: > { %s1681_s16 = sadd.s32 4294967295, %s1634_s15   ;;  %s1249_s17 = sadd.s32 4294967294, %s1634_s15   ;;  %s1634_s15 = sphi %s1666_s15, %s2087_s15   ;;  %s1630_s14 = sphi %s1664_s14, %s2086_s14   ;;  %s1626_s13 = sphi %s1662_s13, %s2085_s13   ;;  %s1622_s12 = sphi %s1660_s12, %s2084_s12  }
   0x4   : > { %s1685_s18 = sadd.s32 1, %s1634_s15   ;;  %s91_s19 = sadd.s32 1, %s1630_s14 }
   0x5   : > { %s88_s20 = ssub.s32 %s1634_s15, %s1685_s18  ;;  %p101_p0 = scmp.ne.s32.totalorder %s1630_s14, %s1626_s13 }
   0x6   : > { %p89_p1 = scmp.eq.s32.totalorder %s88_s20, 0  ;;  %p102_p2 = scmp.eq.s32.totalorder %s1681_s16, 1 }
   0x7   : > { %p107_p3 = scmp.ne.s32.totalorder %s1626_s13, %s1622_s12  ;;  %p108_p4 = scmp.eq.s32.totalorder %s1249_s17, 1 }
   0x8   : > { %s1696_s21 = scalar_select %p89_p1, %s1630_s14, %s91_s19  }
   0x9   : > { %p1698_p5 = por %p102_p2, %p101_p0  ;;  %p1702_p6 = por %p108_p4, %p107_p3 }
   0xa   : > { %p1252_p7 = scmp.ge.s32.totalorder %s1634_s15, 1  ;;  %p140_p8 = scmp.lt.s32.totalorder %s1634_s15, 3 }
   0xc   : > { %p141_p9 = pnand %p1252_p7, %p140_p8 }
   0xd   : > { %p164_p10 = scmp.lt.s32.totalorder (!%p141_p9), %s1681_s16, 1  ;;  %vm175_vm0 = vcmask (!%p141_p9), 523264   ;;  %s1636_s29 = smov (!%p141_p9), 64   ;;  %vm263_vm2 = vcmask (!%p141_p9), 130048   ;;  %vm589_vm3 = vcmask (!%p141_p9), 1048064  }
   0xe   : > { %144 = sbr.rel (%p141_p9) target bundleno = 2126 (0x84e), region = 32  ;;  %vm1717_vm1 = vmpackc.low (!%p141_p9), %vm175_vm0, %vm175_vm0  ;;  %s1284_s26 = sshll.u32 (!%p141_p9), %s1681_s16, 9 }
   0xf   : > { %s2033_s30 = scalar_lea.hbm (!%p141_p9), %s2079_s3, %s1284_s26  ;;  %s1637_s5 = smov (!%p141_p9), [#allocation3]  }
  0x10   : > { %s1576_s6 = sshll.u32 (!%p141_p9), %s1637_s5, 4  ;;  %s1577_s6 = int_to_ptr.vmem [resolvable:$false] %s1576_s6 }
  0x11   : > { %s1578_s7 = scalar_lea.vmem (!%p141_p9), %s1577_s6, 1024 }
  0x15   : > { %s165_s24 = scalar_select %p164_p10, %s1681_s16, 1 }
  0x17   : > { %s1477_s25 = smul.u32 96, %s165_s24 }
  0x19   : > { %s1713_s28 = scalar_lea.vmem %s2076_s0, %s1477_s25 }
  0x1a   : > { %v171_v1 = vld [vmem:[%s1713_s28 + $0x10] sm:$0xff]  ;;  %v172_v2 = vld [vmem:[%s1713_s28 + $0x40] sm:$0xff]  ;;  %v594_v42 = vld [vmem:[%s1713_s28 + $0x18] sm:$0xff] }
  0x1b   : > { %v169_v3 = vld [vmem:[%s1713_s28] sm:$0xff]  ;;  %v1373_v4 = vpack.c.bf16 %v172_v2, %v171_v1  ;;  %v170_v5 = vld [vmem:[%s1713_s28 + $0x30] sm:$0xff]  ;;  %v1520_v6 = vpack.i.bf16 %v172_v2, %v171_v1  ;;  %v595_v43 = vld [vmem:[%s1713_s28 + $0x48] sm:$0xff] }
  0x1c   : > { %1321 = vmatprep.mubr.msk.f32.mxu1 %vm175_vm0, %v169_v3  ;;  %v173_v11 = vld [vmem:[%s1713_s28 + $0x20] sm:$0xff]  ;;  %v174_v12 = vld [vmem:[%s1713_s28 + $0x50] sm:$0xff]  ;;  %v1393_v47 = vpack.c.bf16 %v595_v43, %v594_v42  ;;  %v592_v49 = vld [vmem:[%s1713_s28 + $0x8] sm:$0xff]  ;;  %v1530_v60 = vpack.i.bf16 %v595_v43, %v594_v42 }
  0x1d   : > { %1375 = vmatprep.subr.msk.bf16.mxu1 %vm1717_vm1, %v1373_v4  ;;  %1521 = vrot.lane.b32.xlu1 %v1520_v6, %s1636_s29  ;;  %v1379_v13 = vpack.c.bf16 %v174_v12, %v173_v11  ;;  %v1525_v34 = vpack.i.bf16 %v174_v12, %v173_v11  ;;  %v593_v51 = vld [vmem:[%s1713_s28 + $0x38] sm:$0xff]  ;;  %v596_v58 = vld [vmem:[%s1713_s28 + $0x28] sm:$0xff] }
  0x1e   : > { %1378 = vmatpush3.bf16.xpose.msk.msra.mxu1 %vm1717_vm1, %v1373_v4  ;;  %v597_v59 = vld [vmem:[%s1713_s28 + $0x58] sm:$0xff] }
  0x1f   : > { %1380 = vmatprep.subr.bf16.mxu1 %v1379_v13  ;;  %v1399_v61 = vpack.c.bf16 %v597_v59, %v596_v58 }
  0x21   : > { %377 = vrot.lane.b32.xlu1 %v169_v3, %s1636_s29 }
  0x25   : > { %1322 = vmatmul.mubr.msk.f32.vlgmr.msra.gmra.mrb[0].mxu1 %vm175_vm0, %v170_v5 }
  0x26   : > { %1382 = vmatpush3.bf16.msra.mxu1 %v1379_v13 }
  0x8f   : > { %v1522_v14 = vpop.permute.xlu1 %1521 }
  0x90   : > { %v1524_v15 = vunpack.i.h.bf16 %v1522_v14  ;;  %v1523_v16 = vunpack.i.l.bf16 %v1522_v14 }
  0x92   : > { %v1383_v17 = vpack.c.bf16 %v1524_v15, %v1523_v16 }
  0x93   : > { %v378_v25 = vpop.permute.xlu1 %377 }
  0x94   : > { %1385 = vmatprep.subr.msk.bf16.mxu1 %vm1717_vm1, %v1383_v17 }
  0xf8   : > { %v1323_v7 = vpop.f32.mrb[0].mxu1 }
  0xf9   : > { %v254_v8 = vpop.f32.mrb[1].mxu1  ;;  %v267_v10 = vsel %vm263_vm2, %v1323_v7, -inf }
  0xfa   : > { %v264_v9 = vsel %vm263_vm2, %v254_v8, -inf }
  0xfb   : > { %265 = vmax.xlane.f32.xlu0 %v264_v9 }
  0xff   : > { %268 = vmax.xlane.f32.xlu0 %v267_v10 }
 0x115   : > { %379 = vrot.lane.b32.xlu0 %v170_v5, %s1636_s29 }
 0x188   : > { %v266_v18 = vpop.xlane.xlu0 %265 }
 0x189   : > { %v270_v19 = vsub.f32 %v254_v8, %v266_v18 }
 0x18b   : > { %v272_v20 = vmul.f32 1.442695, %v270_v19  ;;  %v1535_v19 = vpack.i.bf16 %v597_v59, %v596_v58 }
 0x18c   : > { %v269_v21 = vpop.xlane.xlu0 %268 }
 0x18d   : > { %1540 = vpow2.f32 %v272_v20  ;;  %v271_v22 = vsub.f32 %v1323_v7, %v269_v21 }
 0x18f   : > { %v274_v23 = vmul.f32 1.442695, %v271_v22 }
 0x190   : > { %v380_v27 = vpop.permute.xlu0 %379 }
 0x191   : > { %1542 = vpow2.f32 %v274_v23 }
 0x197   : > { %v1740_v24 = vpop.eup %1540 }
 0x198   : > { %1328 = vmatprep.mubr.msk.f32.mxu1 %vm263_vm2, %v1740_v24 }
 0x19b   : > { %v1744_v26 = vpop.eup %1542 }
 0x19c   : > { %1329 = vmatmul.mubr.msk.f32.vlgmr.msra.gmra.mrb[2].mxu1 %vm263_vm2, %v1744_v26 }
 0x19d   : > { %1388 = vmatpush3.bf16.xpose.msk.msra.mxu1 %vm1717_vm1, %v1383_v17  ;;  %1335 = vmatprep.mubr.msk.f32.mxu1 %vm175_vm0, %v378_v25 }
 0x1a4   : > { %1336 = vmatmul.mubr.msk.f32.vlgmr.msra.gmra.mrb[4].mxu1 %vm175_vm0, %v380_v27 }
 0x26f   : > { %v1752_v28 = vpop.f32.mrb[2].mxu1 }
 0x270   : > { %v1754_v29 = vpop.f32.mrb[3].mxu1 }
 0x277   : > { %v1337_v30 = vpop.f32.mrb[4].mxu1 }
 0x278   : > { %v461_v31 = vpop.f32.mrb[5].mxu1  ;;  %v473_v32 = vsel %vm263_vm2, %v1337_v30, -inf }
 0x279   : > { %474 = vmax.xlane.f32.xlu0 %v473_v32  ;;  %v470_v33 = vsel %vm263_vm2, %v461_v31, -inf }
 0x27a   : > { %471 = vmax.xlane.f32.xlu1 %v470_v33 }
 0x28b   : > { %1526 = vrot.lane.b32.xlu1 %v1525_v34, %s1636_s29 }
 0x306   : > { %v475_v35 = vpop.xlane.xlu0 %474 }
 0x307   : > { %v477_v36 = vsub.f32 %v1337_v30, %v475_v35  ;;  %v472_v37 = vpop.xlane.xlu1 %471 }
 0x308   : > { %v476_v38 = vsub.f32 %v461_v31, %v472_v37 }
 0x309   : > { %v480_v39 = vmul.f32 1.442695, %v477_v36 }
 0x30a   : > { %v478_v40 = vmul.f32 1.442695, %v476_v38 }
 0x30b   : > { %v1527_v41 = vpop.permute.xlu1 %1526 }
 0x30c   : > { %1544 = vpow2.f32 %v478_v40  ;;  %v1529_v44 = vunpack.i.h.bf16 %v1527_v41  ;;  %v1528_v45 = vunpack.i.l.bf16 %v1527_v41  ;;  %v276_v41 = vsel %vm263_vm2, %v1740_v24, 0.0  ;;  %v1019_v24 = vld [vmem:[%s2077_s1 + $0x18] sm:$0xff] }
 0x30d   : > { %1546 = vpow2.f32 %v480_v39 }
 0x30e   : > { %v1389_v46 = vpack.c.bf16 %v1529_v44, %v1528_v45  ;;  %v279_v45 = vsel %vm263_vm2, %v1744_v26, 0.0  ;;  %v1021_v26 = vld [vmem:[%s2077_s1 + $0x28] sm:$0xff] }
 0x310   : > { %1390 = vmatprep.subr.bf16.mxu1 %v1389_v46 }
 0x311   : > { %1392 = vmatpush3.bf16.msra.mxu1 %v1389_v46  ;;  %v1017_v46 = vld [vmem:[%s2077_s1 + $0x8] sm:$0xff] }
 0x312   : > { %1395 = vmatprep.subr.msk.bf16.mxu1 %vm1717_vm1, %v1393_v47 }
 0x316   : > { %v1545_v48 = vpop.eup %1544 }
 0x317   : > { %v1764_v50 = vpop.eup %1546  ;;  %1342 = vmatprep.mubr.msk.f32.mxu1 %vm263_vm2, %v1545_v48  ;;  %v482_v0 = vsel %vm263_vm2, %v1545_v48, 0.0  ;;  %v1413_v48 = vpack.c.bf16 %v1019_v24, %v1017_v46  ;;  %v1057_v46 = vld [vmem:[%s2077_s1 + $0x148] sm:$0xff]  ;;  %v1059_v24 = vld [vmem:[%s2077_s1 + $0x158] sm:$0xff] }
 0x318   : > { %1343 = vmatmul.mubr.msk.f32.vlgmr.msra.gmra.mrb[6].mxu1 %vm263_vm2, %v1764_v50  ;;  %v485_v39 = vsel %vm263_vm2, %v1764_v50, 0.0  ;;  %v1023_v50 = vld [vmem:[%s2077_s1 + $0x38] sm:$0xff] }
 0x319   : > { %1349 = vmatprep.mubr.msk.f32.mxu1 %vm175_vm0, %v592_v49  ;;  %1414 = vmatprep.subr.bf16.mxu0 %v1413_v48  ;;  %v1453_v48 = vpack.c.bf16 %v1059_v24, %v1057_v46 }
 0x31a   : > { %1398 = vmatpush3.bf16.xpose.msk.msra.mxu1 %vm1717_vm1, %v1393_v47  ;;  %v1016_v47 = vld [vmem:[%s2077_s1] sm:$0xff] }
 0x31b   : > { %1400 = vmatprep.subr.bf16.mxu1 %v1399_v61 }
 0x321   : > { %1350 = vmatmul.mubr.msk.f32.vlgmr.msra.gmra.mrb[8].mxu1 %vm175_vm0, %v593_v51 }
 0x322   : > { %1402 = vmatpush3.bf16.msra.mxu1 %v1399_v61  ;;  %v1026_v61 = vld [vmem:[%s2077_s1 + $0x50] sm:$0xff] }
 0x3eb   : > { %v1774_v52 = vpop.f32.mrb[6].mxu1 }
 0x3ec   : > { %v1776_v53 = vpop.f32.mrb[7].mxu1 }
 0x3f4   : > { %v1351_v54 = vpop.f32.mrb[8].mxu1 }
 0x3f5   : > { %v676_v55 = vpop.f32.mrb[9].mxu1  ;;  %v688_v56 = vsel %vm263_vm2, %v1351_v54, -inf }
 0x3f6   : > { %689 = vmax.xlane.f32.xlu1 %v688_v56  ;;  %v685_v57 = vsel %vm263_vm2, %v676_v55, -inf  ;;  %v1025_v56 = vld [vmem:[%s2077_s1 + $0x48] sm:$0xff] }
 0x3f7   : > { %686 = vmax.xlane.f32.xlu0 %v685_v57  ;;  %v1027_v57 = vld [vmem:[%s2077_s1 + $0x58] sm:$0xff] }
 0x3f8   : > { %v1421_v59 = vpack.c.bf16 %v1027_v57, %v1025_v56  ;;  %v1062_v56 = vld [vmem:[%s2077_s1 + $0x170] sm:$0xff]  ;;  %v1065_v57 = vld [vmem:[%s2077_s1 + $0x188] sm:$0xff] }
 0x40d   : > { %1531 = vrot.lane.b32.xlu0 %v1530_v60, %s1636_s29  ;;  %v1024_v60 = vld [vmem:[%s2077_s1 + $0x40] sm:$0xff] }
 0x411   : > { %798 = vrot.lane.b32.xlu0 %v592_v49, %s1636_s29  ;;  %v1018_v49 = vld [vmem:[%s2077_s1 + $0x10] sm:$0xff] }
 0x415   : > { %800 = vrot.lane.b32.xlu0 %v593_v51, %s1636_s29  ;;  %v1415_v51 = vpack.c.bf16 %v1018_v49, %v1016_v47  ;;  %v1056_v49 = vld [vmem:[%s2077_s1 + $0x140] sm:$0xff] }
 0x417   : > { %1416 = vmatpush1.bf16.msra.mxu0 %v1415_v51  ;;  %v1063_v51 = vld [vmem:[%s2077_s1 + $0x178] sm:$0xff] }
 0x483   : > { %v690_v62 = vpop.xlane.xlu1 %689 }
 0x484   : > { %v692_v63 = vsub.f32 %v1351_v54, %v690_v62  ;;  %v687_v1 = vpop.xlane.xlu0 %686  ;;  %v1020_v54 = vld [vmem:[%s2077_s1 + $0x20] sm:$0xff]  ;;  %v1029_v62 = vld [vmem:[%s2077_s1 + $0x68] sm:$0xff] }
 0x485   : > { %v691_v2 = vsub.f32 %v676_v55, %v687_v1  ;;  %v1022_v55 = vld [vmem:[%s2077_s1 + $0x30] sm:$0xff]  ;;  %v1423_v1 = vpack.c.bf16 %v1026_v61, %v1024_v60  ;;  %v1064_v61 = vld [vmem:[%s2077_s1 + $0x180] sm:$0xff] }
 0x486   : > { %v695_v3 = vmul.f32 1.442695, %v692_v63  ;;  %v1419_v58 = vpack.c.bf16 %v1022_v55, %v1020_v54  ;;  %v1031_v63 = vld [vmem:[%s2077_s1 + $0x78] sm:$0xff]  ;;  %v1060_v55 = vld [vmem:[%s2077_s1 + $0x160] sm:$0xff] }
 0x487   : > { %v693_v4 = vmul.f32 1.442695, %v691_v2  ;;  %v1425_v2 = vpack.c.bf16 %v1031_v63, %v1029_v62  ;;  %v1066_v62 = vld [vmem:[%s2077_s1 + $0x190] sm:$0xff]  ;;  %v1069_v63 = vld [vmem:[%s2077_s1 + $0x1a8] sm:$0xff] }
 0x488   : > { %v1532_v5 = vpop.permute.xlu0 %1531 }
 0x489   : > { %1548 = vpow2.f32 %v693_v4  ;;  %v1534_v6 = vunpack.i.h.bf16 %v1532_v5  ;;  %v1533_v7 = vunpack.i.l.bf16 %v1532_v5  ;;  %v1030_v4 = vld [vmem:[%s2077_s1 + $0x70] sm:$0xff]  ;;  %v1033_v5 = vld [vmem:[%s2077_s1 + $0x88] sm:$0xff] }
 0x48a   : > { %1550 = vpow2.f32 %v695_v3  ;;  %v1028_v3 = vld [vmem:[%s2077_s1 + $0x60] sm:$0xff] }
 0x48b   : > { %v1403_v8 = vpack.c.bf16 %v1534_v6, %v1533_v7  ;;  %v1035_v6 = vld [vmem:[%s2077_s1 + $0x98] sm:$0xff]  ;;  %v1427_v7 = vpack.c.bf16 %v1030_v4, %v1028_v3  ;;  %v1068_v4 = vld [vmem:[%s2077_s1 + $0x1a0] sm:$0xff] }
 0x48c   : > { %v799_v10 = vpop.permute.xlu0 %798 }
 0x48d   : > { %1405 = vmatprep.subr.msk.bf16.mxu1 %vm1717_vm1, %v1403_v8 }
 0x490   : > { %v801_v12 = vpop.permute.xlu0 %800 }
 0x493   : > { %v1549_v9 = vpop.eup %1548 }
 0x494   : > { %v1551_v11 = vpop.eup %1550  ;;  %1356 = vmatprep.mubr.msk.f32.mxu1 %vm263_vm2, %v1549_v9  ;;  %v697_v40 = vsel %vm263_vm2, %v1549_v9, 0.0  ;;  %v1032_v9 = vld [vmem:[%s2077_s1 + $0x80] sm:$0xff] }
 0x495   : > { %1357 = vmatmul.mubr.msk.f32.vlgmr.msra.gmra.mrb[10].mxu1 %vm263_vm2, %v1551_v11  ;;  %v700_v43 = vsel %vm263_vm2, %v1551_v11, 0.0  ;;  %v1037_v11 = vld [vmem:[%s2077_s1 + $0xa8] sm:$0xff] }
 0x496   : > { %1408 = vmatpush3.bf16.xpose.msk.msra.mxu1 %vm1717_vm1, %v1403_v8  ;;  %1363 = vmatprep.mubr.msk.f32.mxu1 %vm175_vm0, %v799_v10  ;;  %v1429_v8 = vpack.c.bf16 %v1035_v6, %v1033_v5  ;;  %v1034_v10 = vld [vmem:[%s2077_s1 + $0x90] sm:$0xff] }
 0x497   : > { %v1070_v5 = vld [vmem:[%s2077_s1 + $0x1b0] sm:$0xff] }
 0x49d   : > { %1364 = vmatmul.mubr.msk.f32.vlgmr.msra.gmra.mrb[12].mxu1 %vm175_vm0, %v801_v12  ;;  %v1039_v12 = vld [vmem:[%s2077_s1 + $0xb8] sm:$0xff] }
 0x568   : > { %v1793_v13 = vpop.f32.mrb[10].mxu1 }
 0x569   : > { %v1795_v14 = vpop.f32.mrb[11].mxu1 }
 0x570   : > { %v1365_v15 = vpop.f32.mrb[12].mxu1 }
 0x571   : > { %v882_v16 = vpop.f32.mrb[13].mxu1  ;;  %v894_v17 = vsel %vm263_vm2, %v1365_v15, -inf }
 0x572   : > { %895 = vmax.xlane.f32.xlu1 %v894_v17  ;;  %v891_v18 = vsel %vm263_vm2, %v882_v16, -inf  ;;  %v1036_v17 = vld [vmem:[%s2077_s1 + $0xa0] sm:$0xff] }
 0x573   : > { %892 = vmax.xlane.f32.xlu0 %v891_v18  ;;  %v1038_v18 = vld [vmem:[%s2077_s1 + $0xb0] sm:$0xff] }
 0x577   : > { %483 = vadd.xlane.f32.xlu0 %v482_v0  ;;  %v1041_v0 = vld [vmem:[%s2077_s1 + $0xc8] sm:$0xff] }
 0x583   : > { %1536 = vrot.lane.b32.xlu1 %v1535_v19, %s1636_s29  ;;  %v1043_v19 = vld [vmem:[%s2077_s1 + $0xd8] sm:$0xff] }
 0x5ff   : > { %v896_v20 = vpop.xlane.xlu1 %895 }
 0x600   : > { %v898_v21 = vsub.f32 %v1365_v15, %v896_v20  ;;  %v893_v22 = vpop.xlane.xlu0 %892  ;;  %v1431_v15 = vpack.c.bf16 %v1034_v10, %v1032_v9  ;;  %v1435_v20 = vpack.c.bf16 %v1038_v18, %v1036_v17 }
 0x601   : > { %v897_v23 = vsub.f32 %v882_v16, %v893_v22  ;;  %v1433_v16 = vpack.c.bf16 %v1039_v12, %v1037_v11  ;;  %v1040_v22 = vld [vmem:[%s2077_s1 + $0xc0] sm:$0xff] }
 0x602   : > { %v901_v25 = vmul.f32 1.442695, %v898_v21  ;;  %v1437_v21 = vpack.c.bf16 %v1043_v19, %v1041_v0 }
 0x603   : > { %v899_v27 = vmul.f32 1.442695, %v897_v23  ;;  %v1537_v30 = vpop.permute.xlu1 %1536  ;;  %v1042_v23 = vld [vmem:[%s2077_s1 + $0xd0] sm:$0xff] }
 0x604   : > { %1552 = vpow2.f32 %v901_v25  ;;  %v1539_v31 = vunpack.i.h.bf16 %v1537_v30  ;;  %v1538_v32 = vunpack.i.l.bf16 %v1537_v30  ;;  %v484_v37 = vpop.xlane.xlu0 %483  ;;  %v1045_v25 = vld [vmem:[%s2077_s1 + $0xe8] sm:$0xff]  ;;  %v1439_v30 = vpack.c.bf16 %v1042_v23, %v1040_v22  ;;  %v1075_v23 = vld [vmem:[%s2077_s1 + $0x1d8] sm:$0xff] }
 0x605   : > { %1554 = vpow2.f32 %v899_v27  ;;  %v1047_v27 = vld [vmem:[%s2077_s1 + $0xf8] sm:$0xff] }
 0x606   : > { %v1409_v33 = vpack.c.bf16 %v1539_v31, %v1538_v32  ;;  %1556 = vrcp.f32 %v484_v37  ;;  %v1441_v31 = vpack.c.bf16 %v1047_v27, %v1045_v25  ;;  %v1044_v32 = vld [vmem:[%s2077_s1 + $0xe0] sm:$0xff] }
 0x608   : > { %1410 = vmatprep.subr.bf16.mxu1 %v1409_v33 }
 0x609   : > { %1412 = vmatpush3.bf16.msra.mxu1 %v1409_v33  ;;  %v1046_v33 = vld [vmem:[%s2077_s1 + $0xf0] sm:$0xff] }
 0x60e   : > { %v1553_v34 = vpop.eup %1552 }
 0x60f   : > { %v1555_v35 = vpop.eup %1554  ;;  %v906_v36 = vsel %vm263_vm2, %v1553_v34, 0.0 }
 0x610   : > { %907 = vadd.xlane.f32.xlu0 %v906_v36  ;;  %1370 = vmatprep.mubr.msk.f32.mxu1 %vm263_vm2, %v1555_v35  ;;  %v903_v38 = vsel %vm263_vm2, %v1555_v35, 0.0  ;;  %v1557_v42 = vpop.eup %1556  ;;  %v1051_v35 = vld [vmem:[%s2077_s1 + $0x118] sm:$0xff]  ;;  %v1443_v36 = vpack.c.bf16 %v1046_v33, %v1044_v32  ;;  %v1076_v32 = vld [vmem:[%s2077_s1 + $0x1e0] sm:$0xff] }
 0x611   : > { %1371 = vmatmul.mubr.msk.f32.vlgmr.msra.gmra.mrb[14].mxu1 %vm263_vm2, %v1553_v34  ;;  %904 = vadd.xlane.f32.xlu1 %v903_v38  ;;  %v579_v44 = vmul.f32 %v1557_v42, %v1776_v53  ;;  %v1417_v53 = vpack.c.bf16 %v1023_v50, %v1021_v26  ;;  %v1049_v34 = vld [vmem:[%s2077_s1 + $0x108] sm:$0xff]  ;;  %v1048_v38 = vld [vmem:[%s2077_s1 + $0x100] sm:$0xff]  ;;  %v1058_v26 = vld [vmem:[%s2077_s1 + $0x150] sm:$0xff] }
 0x612   : > { %v1445_v37 = vpack.c.bf16 %v1051_v35, %v1049_v34  ;;  %v1061_v50 = vld [vmem:[%s2077_s1 + $0x168] sm:$0xff]  ;;  %v1078_v34 = vld [vmem:[%s2077_s1 + $0x1f0] sm:$0xff] }
 0x613   : > { %1418 = vmatprep.subr.bf16.mxu0 %v1417_v53  ;;  %v1455_v53 = vpack.c.bf16 %v1058_v26, %v1056_v49  ;;  %v1457_v54 = vpack.c.bf16 %v1063_v51, %v1061_v50  ;;  %v1475_v35 = vpack.c.bf16 %v1078_v34, %v1076_v32  ;;  %v1080_v51 = vld [vmem:[%s2078_s2] sm:$0x3] }
 0x614   : > { %486 = vadd.xlane.f32.xlu0 %v485_v39  ;;  %1420 = vmatpush1.bf16.msra.mxu0 %v1419_v58  ;;  %v1050_v39 = vld [vmem:[%s2077_s1 + $0x110] sm:$0xff]  ;;  %v1067_v58 = vld [vmem:[%s2077_s1 + $0x198] sm:$0xff] }
 0x615   : > { %1422 = vmatprep.subr.bf16.mxu0 %v1421_v59  ;;  %v1447_v42 = vpack.c.bf16 %v1050_v39, %v1048_v38  ;;  %v1459_v59 = vpack.c.bf16 %v1062_v56, %v1060_v55  ;;  %v1461_v60 = vpack.c.bf16 %v1067_v58, %v1065_v57 }
 0x618   : > { %698 = vadd.xlane.f32.xlu0 %v697_v40  ;;  %1424 = vmatpush1.bf16.msra.mxu0 %v1423_v1  ;;  %v1053_v40 = vld [vmem:[%s2077_s1 + $0x128] sm:$0xff]  ;;  %v1071_v1 = vld [vmem:[%s2077_s1 + $0x1b8] sm:$0xff] }
 0x619   : > { %1426 = vmatprep.subr.bf16.mxu0 %v1425_v2  ;;  %v1463_v2 = vpack.c.bf16 %v1066_v62, %v1064_v61  ;;  %v1465_v3 = vpack.c.bf16 %v1071_v1, %v1069_v63 }
 0x61c   : > { %277 = vadd.xlane.f32.xlu0 %v276_v41  ;;  %1428 = vmatpush1.bf16.msra.mxu0 %v1427_v7  ;;  %v1055_v41 = vld [vmem:[%s2077_s1 + $0x138] sm:$0xff]  ;;  %v1467_v7 = vpack.c.bf16 %v1070_v5, %v1068_v4 }
 0x61d   : > { %1430 = vmatprep.subr.bf16.mxu0 %v1429_v8 }
 0x620   : > { %701 = vadd.xlane.f32.xlu0 %v700_v43  ;;  %1432 = vmatpush1.bf16.msra.mxu0 %v1431_v15  ;;  %v1449_v43 = vpack.c.bf16 %v1055_v41, %v1053_v40 }
 0x621   : > { %1434 = vmatprep.subr.bf16.mxu0 %v1433_v16 }
 0x622   : > { %583 = vrot.lane.b32.xlu1 %v579_v44, %s1636_s29  ;;  %v1052_v44 = vld [vmem:[%s2077_s1 + $0x120] sm:$0xff] }
 0x624   : > { %280 = vadd.xlane.f32.xlu0 %v279_v45  ;;  %1436 = vmatpush1.bf16.msra.mxu0 %v1435_v20  ;;  %v1054_v45 = vld [vmem:[%s2077_s1 + $0x130] sm:$0xff] }
 0x625   : > { %1438 = vmatprep.subr.bf16.mxu0 %v1437_v21  ;;  %v1451_v47 = vpack.c.bf16 %v1054_v45, %v1052_v44 }
 0x628   : > { %1440 = vmatpush1.bf16.msra.mxu0 %v1439_v30  ;;  %v1077_v30 = vld [vmem:[%s2077_s1 + $0x1e8] sm:$0xff] }
 0x629   : > { %1442 = vmatprep.subr.bf16.mxu0 %v1441_v31  ;;  %v1079_v31 = vld [vmem:[%s2077_s1 + $0x1f8] sm:$0xff] }
 0x62a   : > { %v1473_v33 = vpack.c.bf16 %v1079_v31, %v1077_v30 }
 0x62c   : > { %1444 = vmatpush1.bf16.msra.mxu0 %v1443_v36 }
 0x62d   : > { %1446 = vmatprep.subr.bf16.mxu0 %v1445_v37 }
 0x630   : > { %1448 = vmatpush1.bf16.msra.mxu0 %v1447_v42 }
 0x631   : > { %1450 = vmatprep.subr.bf16.mxu0 %v1449_v43 }
 0x634   : > { %1452 = vmatpush1.bf16.msra.mxu0 %v1451_v47 }
 0x635   : > { %1454 = vmatprep.subr.bf16.mxu0 %v1453_v48 }
 0x638   : > { %1456 = vmatpush1.bf16.msra.mxu0 %v1455_v53 }
 0x639   : > { %1458 = vmatprep.subr.bf16.mxu0 %v1457_v54 }
 0x63c   : > { %1460 = vmatpush1.bf16.msra.mxu0 %v1459_v59 }
 0x63d   : > { %1462 = vmatprep.subr.bf16.mxu0 %v1461_v60 }
 0x640   : > { %1464 = vmatpush1.bf16.msra.mxu0 %v1463_v2 }
 0x641   : > { %1466 = vmatprep.subr.bf16.mxu0 %v1465_v3 }
 0x644   : > { %1468 = vmatpush1.bf16.msra.mxu0 %v1467_v7 }
 0x69d   : > { %v908_v6 = vpop.xlane.xlu0 %907 }
 0x69e   : > { %v905_v15 = vpop.xlane.xlu1 %904 }
 0x6a1   : > { %v487_v8 = vpop.xlane.xlu0 %486 }
 0x6a2   : > { %v584_v19 = vpop.permute.xlu1 %583 }
 0x6a5   : > { %v699_v9 = vpop.xlane.xlu0 %698 }
 0x6a6   : > { %1558 = vrcp.f32 %v699_v9 }
 0x6a9   : > { %v278_v10 = vpop.xlane.xlu0 %277 }
 0x6aa   : > { %1560 = vrcp.f32 %v278_v10 }
 0x6ad   : > { %v702_v11 = vpop.xlane.xlu0 %701 }
 0x6ae   : > { %1562 = vrcp.f32 %v702_v11 }
 0x6b0   : > { %v1559_v12 = vpop.eup %1558 }
 0x6b1   : > { %v281_v16 = vpop.xlane.xlu0 %280  ;;  %v786_v17 = vmul.f32 %v1559_v12, %v1795_v14 }
 0x6b2   : > { %1564 = vrcp.f32 %v281_v16 }
 0x6b3   : > { %788 = vst.msk [vmem:[#allocation2 + $0x8] sm:$0xff] %vm175_vm0, %v786_v17  ;;  %1566 = vrcp.f32 %v908_v6 }
 0x6b4   : > { %v1561_v18 = vpop.eup %1560  ;;  %1568 = vrcp.f32 %v905_v15 }
 0x6b5   : > { %v365_v0 = vmul.f32 %v1561_v18, %v1754_v29  ;;  %v1073_v29 = vld [vmem:[%s2077_s1 + $0x1c8] sm:$0xff]  ;;  %1570 = vrcp.f32 %v487_v8 }
 0x6b6   : > { %v1469_v25 = vpack.c.bf16 %v1075_v23, %v1073_v29 }
 0x6b7   : > { %367 = vst.msk [vmem:[#allocation2] sm:$0xff] %vm175_vm0, %v365_v0 }
 0x6b8   : > { %v1563_v20 = vpop.eup %1562  ;;  %590 = vst.msk [vmem:[#allocation2] sm:$0xff] %vm589_vm3, %v584_v19  ;;  %1470 = vmatprep.subr.bf16.mxu0 %v1469_v25 }
 0x6b9   : > { %v787_v21 = vmul.f32 %v1563_v20, %v1793_v13  ;;  %v1072_v13 = vld [vmem:[%s2077_s1 + $0x1c0] sm:$0xff] }
 0x6bb   : > { %789 = vst.msk [vmem:[#allocation2 + $0x18] sm:$0xff] %vm175_vm0, %v787_v21 }
 0x6bc   : > { %v1565_v22 = vpop.eup %1564 }
 0x6bd   : > { %v366_v14 = vmul.f32 %v1565_v22, %v1752_v28  ;;  %v1074_v28 = vld [vmem:[%s2077_s1 + $0x1d0] sm:$0xff]  ;;  %v1567_v36 = vpop.eup %1566 }
 0x6be   : > { %v1471_v27 = vpack.c.bf16 %v1074_v28, %v1072_v13  ;;  %v1569_v38 = vpop.eup %1568 }
 0x6bf   : > { %368 = vst.msk [vmem:[#allocation2 + $0x10] sm:$0xff] %vm175_vm0, %v366_v14  ;;  %v1571_v41 = vpop.eup %1570  ;;  %v1012_v47 = vld [vmem:[#allocation2] sm:$0xff] }
 0x6c0   : > { %1472 = vmatpush1.bf16.msra.mxu0 %v1471_v27  ;;  %v580_v43 = vmul.f32 %v1571_v41, %v1774_v52  ;;  %v1082_v52 = vlaneseq }
 0x6c1   : > { %1474 = vmatprep.subr.bf16.mxu0 %v1473_v33 }
 0x6c2   : > { %v1083_v26 = vshrl.u32 %v1082_v52, 7 }
 0x6c4   : > { %1476 = vmatpush1.bf16.msra.mxu0 %v1475_v35  ;;  %v1084_v50 = vsub.s32 0, %v1083_v26  ;;  %v1088_v53 = vsub.s32 1, %v1083_v26 }
 0x6c6   : > { %v1085_v54 = vrot.slane %v1080_v51, %v1084_v50  ;;  %v1089_v55 = vrot.slane %v1080_v51, %v1088_v53 }
 0x6e4   : > { %v1372_v37 = vpop.f32.mrb[14].mxu1 }
 0x6e5   : > { %v1001_v39 = vmul.f32 %v1567_v36, %v1372_v37  ;;  %v989_v40 = vpop.f32.mrb[15].mxu1 }
 0x6e6   : > { %v1000_v42 = vmul.f32 %v1569_v38, %v989_v40 }
 0x6e7   : > { %1006 = vrot.lane.b32.xlu1 %v1001_v39, %s1636_s29 }
 0x6e8   : > { %1004 = vrot.lane.b32.xlu0 %v1000_v42, %s1636_s29 }
 0x6eb   : > { %585 = vrot.lane.b32.xlu1 %v580_v43, %s1636_s29  ;;  %s161_s29 = sand.u32 1, %s1626_s13  }
 0x6ec   : > { %s1253_s20 = sshll.u32 %s161_s29, 5  ;;  %s2035_s4 = scalar_lea.sflag [#allocation4], %s161_s29 }
 0x6ed   : > { %s163_s24 = scalar_lea.vmem [#allocation3], %s1253_s20 }
 0x6ee   : > { %s1187_s25 = sshll.u32 %s163_s24, 4  ;;  %s2028_s25 = int_to_ptr.vmem [resolvable:$true] %s1187_s25 }
 0x6ef   : > { %s1572_s16 = scalar_lea.vmem %s2028_s25, 512  ;;  %p1579_p0 = scmp.lt.s32.totalorder %s2028_s25, %s1577_s6 }
 0x6f0   : > { %p1573_p11 = scmp.ne.s32.totalorder %s2028_s25, %s1572_s16  ;;  %p1580_p1 = scmp.lt.s32.totalorder %s1578_s7, %s1572_s16 }
 0x6f2   : > { %p1574_p12 = pnand %p1573_p11, %p1698_p5  ;;  %p1581_p2 = por %p1580_p1, %p1579_p0 }
 0x6f4   : > { %p1575_p13 = pneg %p1574_p12 }
 0x6f6   : > { %p1582_p3 = pnand %p1581_p2, %p1575_p13 }
 0x759   : > { %v1007_v44 = vpop.permute.xlu1 %1006 }
 0x75a   : > { %1011 = vst.msk [vmem:[#allocation2 + $0x18] sm:$0xff] %vm589_vm3, %v1007_v44  ;;  %v1005_v45 = vpop.permute.xlu0 %1004 }
 0x75b   : > { %1010 = vst.msk [vmem:[#allocation2 + $0x8] sm:$0xff] %vm589_vm3, %v1005_v45 }
 0x75d   : > { %v586_v46 = vpop.permute.xlu1 %585 }
 0x75e   : > { %591 = vst.msk [vmem:[#allocation2 + $0x10] sm:$0xff] %vm589_vm3, %v586_v46 }
 0x761   : > { %v1015_v48 = vld [vmem:[#allocation2 + $0x18] sm:$0xff] }
 0x762   : > { %v1013_v24 = vld [vmem:[#allocation2 + $0x8] sm:$0xff] }
 0x763   : > { %1156 = vmatprep.mubr.f32.mxu0 %v1013_v24 }
 0x764   : > { %1157 = vmatmul.mubr.f32.vlgmr.msra.gmra.mrb[0].mxu0 %v1012_v47 }
 0x765   : > { %1162 = vmatprep.mubr.f32.mxu0 %v1015_v48  ;;  %v1014_v49 = vld [vmem:[#allocation2 + $0x10] sm:$0xff] }
 0x768   : > { %1163 = vmatmul.mubr.f32.gmra.mrb[2].mxu0 %v1014_v49 }
 0x837   : > { %v1158_v56 = vpop.f32.mrb[0].mxu0 }
 0x838   : > { %v1159_v57 = vadd.f32 %v1158_v56, %v1085_v54  ;;  %v1160_v58 = vpop.f32.mrb[1].mxu0 }
 0x839   : > { %v1161_v59 = vadd.f32 %v1160_v58, %v1089_v55 }
 0x83a   : > { %1169 = vst [vmem:[%s163_s24] sm:$0xff] %v1159_v57 }
 0x83b   : > { %1170 = vst [vmem:[%s163_s24 + $0x8] sm:$0xff] %v1161_v59  ;;  %v1164_v60 = vpop.f32.mrb[2].mxu0 }
 0x83c   : > { %v1165_v61 = vadd.f32 %v1164_v60, %v1085_v54  ;;  %v1166_v62 = vpop.f32.mrb[3].mxu0 }
 0x83d   : > { %v1167_v63 = vadd.f32 %v1166_v62, %v1089_v55 }
 0x83e   : > { %1171 = vst [vmem:[%s163_s24 + $0x10] sm:$0xff] %v1165_v61 }
 0x83f   : > { %1172 = vst [vmem:[%s163_s24 + $0x18] sm:$0xff] %v1167_v63 }
 0x840   : > { %1585 = shalt.err (!%p1582_p3)
}
 0x841   : > { %s1586_s8 = scalar_lea.hbm %s2033_s30, 512  ;;  %s1590_s11 = scalar_lea.hbm %s2079_s3, 1024 }
 0x842   : > { %p1587_p4 = scmp.ne.s32.totalorder %s2033_s30, %s1586_s8  ;;  %p1591_p9 = scmp.lt.u32.totalorder %s2033_s30, %s2079_s3 }
 0x843   : > { %p1592_p10 = scmp.lt.u32.totalorder %s1590_s11, %s1586_s8  ;;  %p1594_p12 = scmp.lt.u32.totalorder %s1586_s8, %s2033_s30 }
 0x844   : > { %p1588_p7 = pnand %p1587_p4, %p1698_p5 }
 0x845   : > { %p1593_p11 = por %p1592_p10, %p1591_p9 }
 0x846   : > { %p1589_p8 = pneg %p1588_p7 }
 0x847   : > { %p1595_p13 = por %p1594_p12, %p1593_p11 }
 0x849   : > { %p1596_p0 = pnand %p1595_p13, %p1589_p8 }
 0x84b   : > { %1599 = shalt.err (!%p1596_p0)
}
 0x84c   : > { %s1638_s19 = smov 256   ;;  %s1639_s20 = smov 16  }
 0x84d   : > { %1478 = dma.vmem_to_hbm [thread:$0]  (%p1698_p5), %s2028_s25, 512, %s2033_s30, %s2035_s4, %s1638_s19, %s1638_s19, %s1639_s20  }
 0x84e PF: > { %p1484_p1 = scmp.ge.s32.totalorder %s1634_s15, 2  ;;  %s1202_s24 = sand.u32 1, %s1622_s12  }
 0x84f   : > { %s1203_s26 = scalar_lea.sflag [#allocation4], %s1202_s24 }
 0x850   : > { %p1481_p2 = pnand %p1484_p1, %p1702_p6 }
 0x852   : > { %1617 = dma.done.wait (!%p1481_p2), %s1203_s26, 512  }
 0x853   : > { %1619 = vsyncadd (!%p1481_p2), %s1203_s26, 4294966784  ;;  %p13_p3 = scmp.ge.s32.totalorder %s1685_s18, 4   ;;  %s2084_s12 = smov %s1626_s13 }
 0x854   : > { %s2085_s13 = smov %s1630_s14  ;;  %s2086_s14 = smov %s1696_s21 }
 0x855   : > { %s2087_s15 = smov %s1685_s18  ;;  %15 = sbr.rel (!%p13_p3) target bundleno = 3 (0x3), region = 67 }
 0x85c   :  { %1208 = vsyncpa [#allocation4], 1 }
 0x85d   :  { %1210 = vsyncpa [#allocation4 + $0x1], 1 }

</bundles_post_ra>
